<compile_context>
chip_gen: v7x
topology: tpu7x:2x2x1
jax: 0.10.0
libtpu: 0.0.40
codegen_flags: <defaults>
</compile_context>

<pallas_src>
import functools

import jax
import jax.numpy as jnp
from jax.experimental import pallas as pl
from jax.experimental.pallas import tpu as pltpu


# ----------------------------------------------------------------------------
# Helpers
# ----------------------------------------------------------------------------
def _pick_batch_tile(batch, target):
    """Batch tile that is either the full batch or a multiple-of-8 divisor."""
    if batch <= target or batch % 8 != 0:
        return batch
    t = min(target, batch)
    t -= t % 8
    while t >= 8:
        if batch % t == 0:
            return t
        t -= 8
    return batch


# ----------------------------------------------------------------------------
# Kernel 1: conv1 + bias + ReLU + 2x2 max-pool (stacked-corner single matmul)
# ----------------------------------------------------------------------------
def _conv1_pool_kernel(p_ref, w_ref, b_ref, o_ref):
    # p_ref : [4, R, K]  bf16  (4 pool corners, R = tb*144 rows, K = 25)
    # w_ref : [K, 128]   bf16  (Cout = 16 zero-padded to 128 lanes)
    # b_ref : [1, 128]   f32
    # o_ref : [R, 128]   bf16  (lane-dense store)
    _, R, K = p_ref.shape
    N = w_ref.shape[1]
    p = p_ref[...].reshape(4 * R, K)                       # slab-aligned collapse
    z = jnp.dot(p, w_ref[...], preferred_element_type=jnp.float32)   # [4R, 128]
    z = jnp.maximum(z + b_ref[...], 0.0)
    o_ref[...] = jnp.max(z.reshape(4, R, N), axis=0).astype(o_ref.dtype)


def conv1_relu_pool(p4, w, b, *, batch):
    _, r_total, k = p4.shape
    n = w.shape[1]
    rows_per_img = r_total // batch                        # 144
    tb = _pick_batch_tile(batch, 8)
    tm = tb * rows_per_img
    return pl.pallas_call(
        _conv1_pool_kernel,
        out_shape=jax.ShapeDtypeStruct((r_total, n), jnp.bfloat16),
        grid=(batch // tb,),
        in_specs=[
            pl.BlockSpec((4, tm, k), lambda i: (0, i, 0)),
            pl.BlockSpec((k, n), lambda i: (0, 0)),        # weights stay resident
            pl.BlockSpec((1, n), lambda i: (0, 0)),
        ],
        out_specs=pl.BlockSpec((tm, n), lambda i: (i, 0)),
        compiler_params=pltpu.CompilerParams(dimension_semantics=("parallel",)),
    )(p4, w, b)


# ----------------------------------------------------------------------------
# Kernel 2: conv2 + bias + ReLU + pool + fc1 + ReLU + fc (fully fused)
# ----------------------------------------------------------------------------
def _conv2_mlp_kernel(p_ref, w2_ref, b2_ref, fw1_ref, fb1_ref, fw2_ref, fb2_ref,
                      o_ref):
    # p_ref  : [4, tb*32, 400] bf16  (4 pool corners; 25 pooled positions padded
    #                                 to 32 so reshapes stay sublane-aligned)
    # w2_ref : [400, 32] bf16 ; b2_ref : [1, 32] f32
    # fw1_ref: [800, 128] bf16  rows ordered (spatial, channel)
    # fb1_ref: [1, 128] f32
    # fw2_ref: [128, 128] bf16 (10 valid output columns) ; fb2_ref : [1, 128] f32
    # o_ref  : [tb, 128] f32  (lane-dense logits)
    _, R, K = p_ref.shape
    s_pad = 32
    tb = R // s_pad
    C = w2_ref.shape[1]                                    # 32
    n_spatial = fw1_ref.shape[0] // C                      # 25

    # conv2 for all 4 pool corners in one MXU stream
    p = p_ref[...].reshape(4 * R, K)
    z = jnp.dot(p, w2_ref[...], preferred_element_type=jnp.float32)  # [4R, 32]
    z = jnp.maximum(z + b2_ref[...], 0.0)

    # 2x2 max-pool == max over the 4 corner copies (aligned reshape, axis-0 max)
    z = jnp.max(z.reshape(4, tb, s_pad, C), axis=0)        # [tb, 32(s), 32(c)]

    # flatten (spatial, channel) onto the lane axis -> [tb, 800]; the 7 zero-pad
    # spatial slots (s >= 25) are simply dropped here.
    zflat = jnp.concatenate([z[:, s, :] for s in range(n_spatial)], axis=-1)

    # fc1 + ReLU, then fc (output lanes padded to 128)
    h = jnp.dot(zflat.astype(jnp.bfloat16), fw1_ref[...],
                preferred_element_type=jnp.float32) + fb1_ref[...]
    h = jnp.maximum(h, 0.0)
    out = jnp.dot(h.astype(jnp.bfloat16), fw2_ref[...],
                  preferred_element_type=jnp.float32) + fb2_ref[...]
    o_ref[...] = out


def conv2_mlp(p4, w2, b2, fw1, fb1, fw2, fb2, *, batch):
    _, r_total, k = p4.shape
    s_pad = r_total // batch                               # 32
    tb = _pick_batch_tile(batch, 8)
    n_out = fw2.shape[1]                                   # 128 (padded)
    return pl.pallas_call(
        _conv2_mlp_kernel,
        out_shape=jax.ShapeDtypeStruct((batch, n_out), jnp.float32),
        grid=(batch // tb,),
        in_specs=[
            pl.BlockSpec((4, tb * s_pad, k), lambda i: (0, i, 0)),
            pl.BlockSpec(w2.shape, lambda i: (0, 0)),
            pl.BlockSpec(b2.shape, lambda i: (0, 0)),
            pl.BlockSpec(fw1.shape, lambda i: (0, 0)),
            pl.BlockSpec(fb1.shape, lambda i: (0, 0)),
            pl.BlockSpec(fw2.shape, lambda i: (0, 0)),
            pl.BlockSpec(fb2.shape, lambda i: (0, 0)),
        ],
        out_specs=pl.BlockSpec((tb, n_out), lambda i: (i, 0)),
        compiler_params=pltpu.CompilerParams(dimension_semantics=("parallel",)),
    )(p4, w2, b2, fw1, fb1, fw2, fb2)


# ----------------------------------------------------------------------------
# Glue: patch extraction + pool-corner grouping (pure data movement, XLA)
# ----------------------------------------------------------------------------
def _im2col_nhwc(x, k):
    """x: [B,H,W,C] (already padded) -> [B,OH,OW,C*k*k]; column order (c,kh,kw)
    matches PyTorch OIHW weights flattened to [Cout, Cin*k*k]."""
    B, H, W, C = x.shape
    OH, OW = H - k + 1, W - k + 1
    taps = [x[:, i:i + OH, j:j + OW, :] for i in range(k) for j in range(k)]
    cols = jnp.stack(taps, axis=-1)                        # [B, OH, OW, C, k*k]
    return cols.reshape(B, OH, OW, C * k * k)


def _pool_corner_stack(patches, s_pad=None):
    """patches [B,OH,OW,K] (even OH,OW) -> [4, B*S, K]; rows ordered (b, s)."""
    B, OH, OW, K = patches.shape
    PH, PW = OH // 2, OW // 2
    S = PH * PW
    corners = [patches[:, di::2, dj::2, :].reshape(B, S, K)
               for di in (0, 1) for dj in (0, 1)]
    stacked = jnp.stack(corners, axis=0)                   # [4, B, S, K]
    if s_pad is not None and s_pad > S:
        stacked = jnp.pad(stacked, ((0, 0), (0, 0), (0, s_pad - S), (0, 0)))
        S = s_pad
    return stacked.reshape(4, B * S, K)


# ----------------------------------------------------------------------------
# Full forward
# ----------------------------------------------------------------------------
def cnn_fmnist_forward(x, params, num_classes=10):
    B = x.shape[0]

    # conv1 (1->16, k=5, pad=0) + relu + maxpool(2,2)
    x_nhwc = x.reshape(B, 28, 28, 1)
    p1 = _im2col_nhwc(x_nhwc, 5)                                   # [B,24,24,25]
    p1 = _pool_corner_stack(p1).astype(jnp.bfloat16)               # [4,B*144,25]
    y1 = conv1_relu_pool(p1, params["w1m"], params["b1"], batch=B) # [B*144,128]
    y1 = y1[:, :16].reshape(B, 12, 12, 16)                         # NHWC

    # conv2 (16->32, k=5, pad=1) + relu + pool + fc1 + relu + fc (one kernel)
    y1p = jnp.pad(y1, ((0, 0), (1, 1), (1, 1), (0, 0)))            # [B,14,14,16]
    p2 = _im2col_nhwc(y1p, 5)                                      # [B,10,10,400]
    p2 = _pool_corner_stack(p2, s_pad=32).astype(jnp.bfloat16)     # [4,B*32,400]
    logits = conv2_mlp(p2, params["w2m"], params["b2"],
                       params["fw1p"], params["fb1"],
                       params["fw2p"], params["fb2"], batch=B)     # [B,128]
    return logits[:, :num_classes]


# ----------------------------------------------------------------------------
# Pure-JAX f32 reference (for correctness check)
# ----------------------------------------------------------------------------
def reference(x, w1, b1, w2, b2, fw1, fb1, fw2, fb2):
    dn = ("NCHW", "OIHW", "NCHW")
    y = jax.lax.conv_general_dilated(x, w1, (1, 1), [(0, 0), (0, 0)],
                                     dimension_numbers=dn)
    y = jnp.maximum(y + b1.reshape(1, -1, 1, 1), 0.0)
    y = jax.lax.reduce_window(y, -jnp.inf, jax.lax.max,
                              (1, 1, 2, 2), (1, 1, 2, 2), "VALID")
    y = jax.lax.conv_general_dilated(y, w2, (1, 1), [(1, 1), (1, 1)],
                                     dimension_numbers=dn)
    y = jnp.maximum(y + b2.reshape(1, -1, 1, 1), 0.0)
    y = jax.lax.reduce_window(y, -jnp.inf, jax.lax.max,
                              (1, 1, 2, 2), (1, 1, 2, 2), "VALID")
    y = y.reshape(y.shape[0], -1)
    y = jnp.maximum(y @ fw1.T + fb1, 0.0)
    return y @ fw2.T + fb2


if __name__ == "__main__":
    num_classes = 10
    B = 2  # spatial must be 28x28 so that fc1 sees 32*5*5 = 800

    key = jax.random.PRNGKey(0)
    ks = jax.random.split(key, 9)

    def uinit(k, shape, fan_in):
        bound = 1.0 / float(fan_in) ** 0.5
        return jax.random.uniform(k, shape, jnp.float32, -bound, bound)

    # PyTorch-shaped parameters (deterministic synthetic init)
    w1 = uinit(ks[0], (16, 1, 5, 5), 1 * 5 * 5)
    b1 = uinit(ks[1], (16,), 1 * 5 * 5)
    w2 = uinit(ks[2], (32, 16, 5, 5), 16 * 5 * 5)
    b2 = uinit(ks[3], (32,), 16 * 5 * 5)
    fw1 = uinit(ks[4], (128, 800), 800)
    fb1 = uinit(ks[5], (128,), 800)
    fw2 = uinit(ks[6], (num_classes, 128), 128)
    fb2 = uinit(ks[7], (num_classes,), 128)

    # Kernel-layout parameters (lane-padded, bf16 for MXU operands)
    w1m = jnp.zeros((25, 128), jnp.float32).at[:, :16].set(w1.reshape(16, 25).T)
    b1p = jnp.zeros((1, 128), jnp.float32).at[:, :16].set(b1)
    w2m = w2.reshape(32, 400).T                                   # [400, 32]
    b2p = b2.reshape(1, 32)
    # fc1 rows reordered from (channel, spatial) to (spatial, channel)
    fw1p = fw1.T.reshape(32, 25, 128).transpose(1, 0, 2).reshape(800, 128)
    fb1p = fb1.reshape(1, 128)
    fw2p = jnp.zeros((128, 128), jnp.float32).at[:, :num_classes].set(fw2.T)
    fb2p = jnp.zeros((1, 128), jnp.float32).at[:, :num_classes].set(fb2)

    params = {
        "w1m": w1m.astype(jnp.bfloat16),
        "b1": b1p,
        "w2m": w2m.astype(jnp.bfloat16),
        "b2": b2p,
        "fw1p": fw1p.astype(jnp.bfloat16),
        "fb1": fb1p,
        "fw2p": fw2p.astype(jnp.bfloat16),
        "fb2": fb2p,
    }

    x = jax.random.normal(ks[8], (B, 1, 28, 28), jnp.float32)

    fwd = jax.jit(functools.partial(cnn_fmnist_forward, num_classes=num_classes))
    out = jax.block_until_ready(fwd(x, params))
    assert out.shape == (B, num_classes), out.shape

    # bf16 MXU inputs (f32 accumulation) -> compare with a loosened tolerance.
    ref = reference(x, w1, b1, w2, b2, fw1, fb1, fw2, fb2)
    assert jnp.allclose(out, ref, atol=3e-2, rtol=3e-2), (
        float(jnp.max(jnp.abs(out - ref))))

    print("KERNEL_OK")
</pallas_src>

<mosaic_0001>
module attributes {stable_mosaic.version = 11 : i64} {
  func.func @_conv1_pool_kernel(%arg0: i32, %arg1: memref<4x288x25xbf16, #tpu.memory_space<vmem>>, %arg2: memref<25x128xbf16, #tpu.memory_space<vmem>>, %arg3: memref<1x128xf32, #tpu.memory_space<vmem>>, %arg4: memref<288x128xbf16, #tpu.memory_space<vmem>>) attributes {dimension_semantics = [#tpu.dimension_semantics<parallel>], iteration_bounds = array<i64: 1>, scalar_prefetch = 0 : i64, scratch_operands = 0 : i64, tpu.core_type = #tpu.core_type<tc>, window_params = [{transform_indices = @transform_0, window_bounds = array<i64: 4, 288, 25>}, {pipeline_mode = #tpu.pipeline_mode<synchronous>, transform_indices = @transform_1, window_bounds = array<i64: 25, 128>}, {pipeline_mode = #tpu.pipeline_mode<synchronous>, transform_indices = @transform_2, window_bounds = array<i64: 1, 128>}, {transform_indices = @transform_3, window_bounds = array<i64: 288, 128>}]} {
    %c0 = arith.constant 0 : index
    %c0_0 = arith.constant 0 : index
    %c0_1 = arith.constant 0 : index
    %0 = vector.load %arg1[%c0, %c0_0, %c0_1] : memref<4x288x25xbf16, #tpu.memory_space<vmem>>, vector<4x288x25xbf16>
    %1 = vector.shape_cast %0 : vector<4x288x25xbf16> to vector<1152x25xbf16>
    %c0_2 = arith.constant 0 : index
    %c0_3 = arith.constant 0 : index
    %2 = vector.load %arg2[%c0_2, %c0_3] : memref<25x128xbf16, #tpu.memory_space<vmem>>, vector<25x128xbf16>
    %cst = arith.constant dense<0.000000e+00> : vector<1152x128xf32>
    %3 = tpu.matmul %1, %2, %cst {dimension_numbers = #tpu.dot_dimension_numbers<[1], [0], [0], [1], [0, 0, 1, 1], [], []>} : vector<1152x25xbf16>, vector<25x128xbf16>, vector<1152x128xf32> -> vector<1152x128xf32>
    %c0_4 = arith.constant 0 : index
    %c0_5 = arith.constant 0 : index
    %4 = vector.load %arg3[%c0_4, %c0_5] : memref<1x128xf32, #tpu.memory_space<vmem>>, vector<1x128xf32>
    %5 = vector.broadcast %4 : vector<1x128xf32> to vector<1152x128xf32>
    %6 = arith.addf %3, %5 : vector<1152x128xf32>
    %cst_6 = arith.constant 0.000000e+00 : f32
    %7 = vector.broadcast %cst_6 : f32 to vector<1152x128xf32>
    %8 = arith.maximumf %6, %7 : vector<1152x128xf32>
    %9 = vector.shape_cast %8 : vector<1152x128xf32> to vector<4x288x128xf32>
    %cst_7 = arith.constant dense<0xFF800000> : vector<288x128xf32>
    %10 = vector.multi_reduction <maximumf>, %9, %cst_7 [0] : vector<4x288x128xf32> to vector<288x128xf32>
    %11 = arith.truncf %10 : vector<288x128xf32> to vector<288x128xbf16>
    %c0_8 = arith.constant 0 : index
    %c0_9 = arith.constant 0 : index
    %12 = vector.load %arg4[%c0_8, %c0_9] : memref<288x128xbf16, #tpu.memory_space<vmem>>, vector<288x128xbf16>
    tpu.vector_store %arg4[%c0_8, %c0_9], %11 {strides = array<i32>} : memref<288x128xbf16, #tpu.memory_space<vmem>>, vector<288x128xbf16>,
    return
  }
  func.func @transform_0(%arg0: i32) -> (i32, i32, i32) {
    %c0_i32 = arith.constant 0 : i32
    %c0_i32_0 = arith.constant 0 : i32
    %c0_i32_1 = arith.constant 0 : i32
    return %c0_i32, %arg0, %c0_i32_0 : i32, i32, i32
  }
  func.func @transform_1(%arg0: i32) -> (i32, i32) {
    %c0_i32 = arith.constant 0 : i32
    %c0_i32_0 = arith.constant 0 : i32
    %c0_i32_1 = arith.constant 0 : i32
    return %c0_i32, %c0_i32_0 : i32, i32
  }
  func.func @transform_2(%arg0: i32) -> (i32, i32) {
    %c0_i32 = arith.constant 0 : i32
    %c0_i32_0 = arith.constant 0 : i32
    %c0_i32_1 = arith.constant 0 : i32
    return %c0_i32, %c0_i32_0 : i32, i32
  }
  func.func @transform_3(%arg0: i32) -> (i32, i32) {
    %c0_i32 = arith.constant 0 : i32
    %c0_i32_0 = arith.constant 0 : i32
    return %arg0, %c0_i32 : i32, i32
  }
}

module attributes {stable_mosaic.version = 11 : i64} {
  func.func @_conv2_mlp_kernel(%arg0: i32, %arg1: memref<4x64x400xbf16, #tpu.memory_space<vmem>>, %arg2: memref<400x32xbf16, #tpu.memory_space<vmem>>, %arg3: memref<1x32xf32, #tpu.memory_space<vmem>>, %arg4: memref<800x128xbf16, #tpu.memory_space<vmem>>, %arg5: memref<1x128xf32, #tpu.memory_space<vmem>>, %arg6: memref<128x128xbf16, #tpu.memory_space<vmem>>, %arg7: memref<1x128xf32, #tpu.memory_space<vmem>>, %arg8: memref<2x128xf32, #tpu.memory_space<vmem>>) attributes {dimension_semantics = [#tpu.dimension_semantics<parallel>], iteration_bounds = array<i64: 1>, scalar_prefetch = 0 : i64, scratch_operands = 0 : i64, tpu.core_type = #tpu.core_type<tc>, window_params = [{transform_indices = @transform_0, window_bounds = array<i64: 4, 64, 400>}, {pipeline_mode = #tpu.pipeline_mode<synchronous>, transform_indices = @transform_1, window_bounds = array<i64: 400, 32>}, {pipeline_mode = #tpu.pipeline_mode<synchronous>, transform_indices = @transform_2, window_bounds = array<i64: 1, 32>}, {pipeline_mode = #tpu.pipeline_mode<synchronous>, transform_indices = @transform_3, window_bounds = array<i64: 800, 128>}, {pipeline_mode = #tpu.pipeline_mode<synchronous>, transform_indices = @transform_4, window_bounds = array<i64: 1, 128>}, {pipeline_mode = #tpu.pipeline_mode<synchronous>, transform_indices = @transform_5, window_bounds = array<i64: 128, 128>}, {pipeline_mode = #tpu.pipeline_mode<synchronous>, transform_indices = @transform_6, window_bounds = array<i64: 1, 128>}, {transform_indices = @transform_7, window_bounds = array<i64: 2, 128>}]} {
    %c0 = arith.constant 0 : index
    %c0_0 = arith.constant 0 : index
    %c0_1 = arith.constant 0 : index
    %0 = vector.load %arg1[%c0, %c0_0, %c0_1] : memref<4x64x400xbf16, #tpu.memory_space<vmem>>, vector<4x64x400xbf16>
    %1 = vector.shape_cast %0 : vector<4x64x400xbf16> to vector<256x400xbf16>
    %c0_2 = arith.constant 0 : index
    %c0_3 = arith.constant 0 : index
    %2 = vector.load %arg2[%c0_2, %c0_3] : memref<400x32xbf16, #tpu.memory_space<vmem>>, vector<400x32xbf16>
    %cst = arith.constant dense<0.000000e+00> : vector<256x32xf32>
    %3 = tpu.matmul %1, %2, %cst {dimension_numbers = #tpu.dot_dimension_numbers<[1], [0], [0], [1], [0, 0, 1, 1], [], []>} : vector<256x400xbf16>, vector<400x32xbf16>, vector<256x32xf32> -> vector<256x32xf32>
    %c0_4 = arith.constant 0 : index
    %c0_5 = arith.constant 0 : index
    %4 = vector.load %arg3[%c0_4, %c0_5] : memref<1x32xf32, #tpu.memory_space<vmem>>, vector<1x32xf32>
    %5 = vector.broadcast %4 : vector<1x32xf32> to vector<256x32xf32>
    %6 = arith.addf %3, %5 : vector<256x32xf32>
    %cst_6 = arith.constant 0.000000e+00 : f32
    %7 = vector.broadcast %cst_6 : f32 to vector<256x32xf32>
    %8 = arith.maximumf %6, %7 : vector<256x32xf32>
    %9 = vector.shape_cast %8 : vector<256x32xf32> to vector<4x2x32x32xf32>
    %cst_7 = arith.constant dense<0xFF800000> : vector<2x32x32xf32>
    %10 = vector.multi_reduction <maximumf>, %9, %cst_7 [0] : vector<4x2x32x32xf32> to vector<2x32x32xf32>
    %11 = vector.extract_strided_slice %10 {offsets = [0, 0, 0], sizes = [2, 1, 32], strides = [1, 1, 1]} : vector<2x32x32xf32> to vector<2x1x32xf32>
    %12 = vector.shape_cast %11 : vector<2x1x32xf32> to vector<2x32xf32>
    %13 = vector.extract_strided_slice %10 {offsets = [0, 1, 0], sizes = [2, 1, 32], strides = [1, 1, 1]} : vector<2x32x32xf32> to vector<2x1x32xf32>
    %14 = vector.shape_cast %13 : vector<2x1x32xf32> to vector<2x32xf32>
    %15 = vector.extract_strided_slice %10 {offsets = [0, 2, 0], sizes = [2, 1, 32], strides = [1, 1, 1]} : vector<2x32x32xf32> to vector<2x1x32xf32>
    %16 = vector.shape_cast %15 : vector<2x1x32xf32> to vector<2x32xf32>
    %17 = vector.extract_strided_slice %10 {offsets = [0, 3, 0], sizes = [2, 1, 32], strides = [1, 1, 1]} : vector<2x32x32xf32> to vector<2x1x32xf32>
    %18 = vector.shape_cast %17 : vector<2x1x32xf32> to vector<2x32xf32>
    %19 = vector.extract_strided_slice %10 {offsets = [0, 4, 0], sizes = [2, 1, 32], strides = [1, 1, 1]} : vector<2x32x32xf32> to vector<2x1x32xf32>
    %20 = vector.shape_cast %19 : vector<2x1x32xf32> to vector<2x32xf32>
    %21 = vector.extract_strided_slice %10 {offsets = [0, 5, 0], sizes = [2, 1, 32], strides = [1, 1, 1]} : vector<2x32x32xf32> to vector<2x1x32xf32>
    %22 = vector.shape_cast %21 : vector<2x1x32xf32> to vector<2x32xf32>
    %23 = vector.extract_strided_slice %10 {offsets = [0, 6, 0], sizes = [2, 1, 32], strides = [1, 1, 1]} : vector<2x32x32xf32> to vector<2x1x32xf32>
    %24 = vector.shape_cast %23 : vector<2x1x32xf32> to vector<2x32xf32>
    %25 = vector.extract_strided_slice %10 {offsets = [0, 7, 0], sizes = [2, 1, 32], strides = [1, 1, 1]} : vector<2x32x32xf32> to vector<2x1x32xf32>
    %26 = vector.shape_cast %25 : vector<2x1x32xf32> to vector<2x32xf32>
    %27 = vector.extract_strided_slice %10 {offsets = [0, 8, 0], sizes = [2, 1, 32], strides = [1, 1, 1]} : vector<2x32x32xf32> to vector<2x1x32xf32>
    %28 = vector.shape_cast %27 : vector<2x1x32xf32> to vector<2x32xf32>
    %29 = vector.extract_strided_slice %10 {offsets = [0, 9, 0], sizes = [2, 1, 32], strides = [1, 1, 1]} : vector<2x32x32xf32> to vector<2x1x32xf32>
    %30 = vector.shape_cast %29 : vector<2x1x32xf32> to vector<2x32xf32>
    %31 = vector.extract_strided_slice %10 {offsets = [0, 10, 0], sizes = [2, 1, 32], strides = [1, 1, 1]} : vector<2x32x32xf32> to vector<2x1x32xf32>
    %32 = vector.shape_cast %31 : vector<2x1x32xf32> to vector<2x32xf32>
    %33 = vector.extract_strided_slice %10 {offsets = [0, 11, 0], sizes = [2, 1, 32], strides = [1, 1, 1]} : vector<2x32x32xf32> to vector<2x1x32xf32>
    %34 = vector.shape_cast %33 : vector<2x1x32xf32> to vector<2x32xf32>
    %35 = vector.extract_strided_slice %10 {offsets = [0, 12, 0], sizes = [2, 1, 32], strides = [1, 1, 1]} : vector<2x32x32xf32> to vector<2x1x32xf32>
    %36 = vector.shape_cast %35 : vector<2x1x32xf32> to vector<2x32xf32>
    %37 = vector.extract_strided_slice %10 {offsets = [0, 13, 0], sizes = [2, 1, 32], strides = [1, 1, 1]} : vector<2x32x32xf32> to vector<2x1x32xf32>
    %38 = vector.shape_cast %37 : vector<2x1x32xf32> to vector<2x32xf32>
    %39 = vector.extract_strided_slice %10 {offsets = [0, 14, 0], sizes = [2, 1, 32], strides = [1, 1, 1]} : vector<2x32x32xf32> to vector<2x1x32xf32>
    %40 = vector.shape_cast %39 : vector<2x1x32xf32> to vector<2x32xf32>
    %41 = vector.extract_strided_slice %10 {offsets = [0, 15, 0], sizes = [2, 1, 32], strides = [1, 1, 1]} : vector<2x32x32xf32> to vector<2x1x32xf32>
    %42 = vector.shape_cast %41 : vector<2x1x32xf32> to vector<2x32xf32>
    %43 = vector.extract_strided_slice %10 {offsets = [0, 16, 0], sizes = [2, 1, 32], strides = [1, 1, 1]} : vector<2x32x32xf32> to vector<2x1x32xf32>
    %44 = vector.shape_cast %43 : vector<2x1x32xf32> to vector<2x32xf32>
    %45 = vector.extract_strided_slice %10 {offsets = [0, 17, 0], sizes = [2, 1, 32], strides = [1, 1, 1]} : vector<2x32x32xf32> to vector<2x1x32xf32>
    %46 = vector.shape_cast %45 : vector<2x1x32xf32> to vector<2x32xf32>
    %47 = vector.extract_strided_slice %10 {offsets = [0, 18, 0], sizes = [2, 1, 32], strides = [1, 1, 1]} : vector<2x32x32xf32> to vector<2x1x32xf32>
    %48 = vector.shape_cast %47 : vector<2x1x32xf32> to vector<2x32xf32>
    %49 = vector.extract_strided_slice %10 {offsets = [0, 19, 0], sizes = [2, 1, 32], strides = [1, 1, 1]} : vector<2x32x32xf32> to vector<2x1x32xf32>
    %50 = vector.shape_cast %49 : vector<2x1x32xf32> to vector<2x32xf32>
    %51 = vector.extract_strided_slice %10 {offsets = [0, 20, 0], sizes = [2, 1, 32], strides = [1, 1, 1]} : vector<2x32x32xf32> to vector<2x1x32xf32>
    %52 = vector.shape_cast %51 : vector<2x1x32xf32> to vector<2x32xf32>
    %53 = vector.extract_strided_slice %10 {offsets = [0, 21, 0], sizes = [2, 1, 32], strides = [1, 1, 1]} : vector<2x32x32xf32> to vector<2x1x32xf32>
    %54 = vector.shape_cast %53 : vector<2x1x32xf32> to vector<2x32xf32>
    %55 = vector.extract_strided_slice %10 {offsets = [0, 22, 0], sizes = [2, 1, 32], strides = [1, 1, 1]} : vector<2x32x32xf32> to vector<2x1x32xf32>
    %56 = vector.shape_cast %55 : vector<2x1x32xf32> to vector<2x32xf32>
    %57 = vector.extract_strided_slice %10 {offsets = [0, 23, 0], sizes = [2, 1, 32], strides = [1, 1, 1]} : vector<2x32x32xf32> to vector<2x1x32xf32>
    %58 = vector.shape_cast %57 : vector<2x1x32xf32> to vector<2x32xf32>
    %59 = vector.extract_strided_slice %10 {offsets = [0, 24, 0], sizes = [2, 1, 32], strides = [1, 1, 1]} : vector<2x32x32xf32> to vector<2x1x32xf32>
    %60 = vector.shape_cast %59 : vector<2x1x32xf32> to vector<2x32xf32>
    %61 = tpu.concatenate %12, %14, %16, %18, %20, %22, %24, %26, %28, %30, %32, %34, %36, %38, %40, %42 in 1 : vector<2x32xf32>, vector<2x32xf32>, vector<2x32xf32>, vector<2x32xf32>, vector<2x32xf32>, vector<2x32xf32>, vector<2x32xf32>, vector<2x32xf32>, vector<2x32xf32>, vector<2x32xf32>, vector<2x32xf32>, vector<2x32xf32>, vector<2x32xf32>, vector<2x32xf32>, vector<2x32xf32>, vector<2x32xf32> -> vector<2x512xf32>
    %62 = tpu.concatenate %44, %46, %48, %50, %52, %54, %56, %58, %60 in 1 : vector<2x32xf32>, vector<2x32xf32>, vector<2x32xf32>, vector<2x32xf32>, vector<2x32xf32>, vector<2x32xf32>, vector<2x32xf32>, vector<2x32xf32>, vector<2x32xf32> -> vector<2x288xf32>
    %63 = tpu.concatenate %61, %62 in 1 : vector<2x512xf32>, vector<2x288xf32> -> vector<2x800xf32>
    %64 = arith.truncf %63 : vector<2x800xf32> to vector<2x800xbf16>
    %c0_8 = arith.constant 0 : index
    %c0_9 = arith.constant 0 : index
    %65 = vector.load %arg4[%c0_8, %c0_9] : memref<800x128xbf16, #tpu.memory_space<vmem>>, vector<800x128xbf16>
    %cst_10 = arith.constant dense<0.000000e+00> : vector<2x128xf32>
    %66 = tpu.matmul %64, %65, %cst_10 {dimension_numbers = #tpu.dot_dimension_numbers<[1], [0], [0], [1], [0, 0, 1, 1], [], []>} : vector<2x800xbf16>, vector<800x128xbf16>, vector<2x128xf32> -> vector<2x128xf32>
    %c0_11 = arith.constant 0 : index
    %c0_12 = arith.constant 0 : index
    %67 = vector.load %arg5[%c0_11, %c0_12] : memref<1x128xf32, #tpu.memory_space<vmem>>, vector<1x128xf32>
    %68 = vector.broadcast %67 : vector<1x128xf32> to vector<2x128xf32>
    %69 = arith.addf %66, %68 : vector<2x128xf32>
    %cst_13 = arith.constant 0.000000e+00 : f32
    %70 = vector.broadcast %cst_13 : f32 to vector<2x128xf32>
    %71 = arith.maximumf %69, %70 : vector<2x128xf32>
    %72 = arith.truncf %71 : vector<2x128xf32> to vector<2x128xbf16>
    %c0_14 = arith.constant 0 : index
    %c0_15 = arith.constant 0 : index
    %73 = vector.load %arg6[%c0_14, %c0_15] : memref<128x128xbf16, #tpu.memory_space<vmem>>, vector<128x128xbf16>
    %cst_16 = arith.constant dense<0.000000e+00> : vector<2x128xf32>
    %74 = tpu.matmul %72, %73, %cst_16 {dimension_numbers = #tpu.dot_dimension_numbers<[1], [0], [0], [1], [0, 0, 1, 1], [], []>} : vector<2x128xbf16>, vector<128x128xbf16>, vector<2x128xf32> -> vector<2x128xf32>
    %c0_17 = arith.constant 0 : index
    %c0_18 = arith.constant 0 : index
    %75 = vector.load %arg7[%c0_17, %c0_18] : memref<1x128xf32, #tpu.memory_space<vmem>>, vector<1x128xf32>
    %76 = vector.broadcast %75 : vector<1x128xf32> to vector<2x128xf32>
    %77 = arith.addf %74, %76 : vector<2x128xf32>
    %c0_19 = arith.constant 0 : index
    %c0_20 = arith.constant 0 : index
    %78 = vector.load %arg8[%c0_19, %c0_20] : memref<2x128xf32, #tpu.memory_space<vmem>>, vector<2x128xf32>
    tpu.vector_store %arg8[%c0_19, %c0_20], %77 {strides = array<i32>} : memref<2x128xf32, #tpu.memory_space<vmem>>, vector<2x128xf32>,
    return
  }
  func.func @transform_0(%arg0: i32) -> (i32, i32, i32) {
    %c0_i32 = arith.constant 0 : i32
    %c0_i32_0 = arith.constant 0 : i32
    %c0_i32_1 = arith.constant 0 : i32
    return %c0_i32, %arg0, %c0_i32_0 : i32, i32, i32
  }
  func.func @transform_1(%arg0: i32) -> (i32, i32) {
    %c0_i32 = arith.constant 0 : i32
    %c0_i32_0 = arith.constant 0 : i32
    %c0_i32_1 = arith.constant 0 : i32
    return %c0_i32, %c0_i32_0 : i32, i32
  }
  func.func @transform_2(%arg0: i32) -> (i32, i32) {
    %c0_i32 = arith.constant 0 : i32
    %c0_i32_0 = arith.constant 0 : i32
    %c0_i32_1 = arith.constant 0 : i32
    return %c0_i32, %c0_i32_0 : i32, i32
  }
  func.func @transform_3(%arg0: i32) -> (i32, i32) {
    %c0_i32 = arith.constant 0 : i32
    %c0_i32_0 = arith.constant 0 : i32
    %c0_i32_1 = arith.constant 0 : i32
    return %c0_i32, %c0_i32_0 : i32, i32
  }
  func.func @transform_4(%arg0: i32) -> (i32, i32) {
    %c0_i32 = arith.constant 0 : i32
    %c0_i32_0 = arith.constant 0 : i32
    %c0_i32_1 = arith.constant 0 : i32
    return %c0_i32, %c0_i32_0 : i32, i32
  }
  func.func @transform_5(%arg0: i32) -> (i32, i32) {
    %c0_i32 = arith.constant 0 : i32
    %c0_i32_0 = arith.constant 0 : i32
    %c0_i32_1 = arith.constant 0 : i32
    return %c0_i32, %c0_i32_0 : i32, i32
  }
  func.func @transform_6(%arg0: i32) -> (i32, i32) {
    %c0_i32 = arith.constant 0 : i32
    %c0_i32_0 = arith.constant 0 : i32
    %c0_i32_1 = arith.constant 0 : i32
    return %c0_i32, %c0_i32_0 : i32, i32
  }
  func.func @transform_7(%arg0: i32) -> (i32, i32) {
    %c0_i32 = arith.constant 0 : i32
    %c0_i32_0 = arith.constant 0 : i32
    return %arg0, %c0_i32 : i32, i32
  }
}

</mosaic_0001>

<bundles_post_ra>
// kernel: cnn_fmnist_forward.2
= control target key start
LH: loop header
LB: loop body
LE: loop exit
PB: predicated region body
PF: predicated region fallthrough
CT: control target
= control target key end

     0   :  { %vm758_vm0 = vcmask 1043456   ;;  %vm759_vm1 = vcmask 1044480   ;;  %vm541_vm2 = vcmask 203776   ;;  %v2438_v1 = vmov 65535   ;;  %s3474_s1 = inlined_call_operand.vmem [shape: bf16[25,128], index: 1, kind: input, shape index: {}]   ;;  %s3475_s0 = inlined_call_operand.vmem [shape: bf16[4,288,25], index: 0, kind: input, shape index: {}]   ;;  %s3476_s2 = inlined_call_operand.vmem [shape: f32[1,128], index: 2, kind: input, shape index: {}]   ;;  %s3477_s3 = inlined_call_operand.vmem [shape: bf16[288,128], index: 3, kind: output, shape index: {}]  }
   0x1   :  { %v2363_v0 = vld [vmem:[%s3474_s1] sm:$0xff]   ;;  %v760_v2 = vsel %vm758_vm0, 4294967295, %v2438_v1  ;;  %v2364_v3 = vld [vmem:[%s3474_s1 + $0x8] sm:$0x1f]   ;;  %v2369_v10 = vld [vmem:[%s3475_s0 + $0x10] sm:$0xff]  }
   0x2   :  { %2210 = vmatprep.subr.bf16.mxu0 %v2363_v0  ;;  %2358 = vmatprep.subr.bf16.mxu1 %v2363_v0  ;;  %v761_v4 = vsel %vm759_vm1, %v760_v2, 0  ;;  %v2365_v5 = vld [vmem:[%s3475_s0] sm:$0xff]   ;;  %v2366_v8 = vld [vmem:[%s3475_s0 + $0x8] sm:$0xff]   ;;  %v2371_v11 = vld [vmem:[%s3475_s0 + $0x130] sm:$0xff]  }
   0x3   :  { %2211 = vmatpush3.bf16.msra.mxu0 %v2363_v0  ;;  %2360 = vmatpush3.bf16.msra.mxu1 %v2363_v0  ;;  %v763_v6 = vand.u32 %v2364_v3, %v761_v4  ;;  %v2367_v7 = vld [vmem:[%s3475_s0 + $0x120] sm:$0xff]   ;;  %v2368_v9 = vld [vmem:[%s3475_s0 + $0x128] sm:$0xff]   ;;  %v2370_v12 = vld [vmem:[%s3475_s0 + $0x18] sm:$0xff]  }
   0x4   :  { %2214 = vmatprep.mubr.msk.bf16.mxu0 %vm541_vm2, %v2365_v5  ;;  %2286 = vmatprep.mubr.msk.bf16.mxu1 %vm541_vm2, %v2367_v7  ;;  %v2372_v13 = vld [vmem:[%s3475_s0 + $0x138] sm:$0xff]   ;;  %v2373_v14 = vld [vmem:[%s3475_s0 + $0x20] sm:$0xff]   ;;  %v2374_v16 = vld [vmem:[%s3475_s0 + $0x28] sm:$0xff]  }
   0x5   :  { %2212 = vmatprep.subr.bf16.mxu0 %v763_v6  ;;  %2359 = vmatprep.subr.bf16.mxu1 %v763_v6  ;;  %v2375_v15 = vld [vmem:[%s3475_s0 + $0x140] sm:$0xff]   ;;  %v2376_v17 = vld [vmem:[%s3475_s0 + $0x148] sm:$0xff]   ;;  %v2377_v18 = vld [vmem:[%s3475_s0 + $0x30] sm:$0xff]  }
   0x6   :  { %v2379_v19 = vld [vmem:[%s3475_s0 + $0x150] sm:$0xff]   ;;  %v2378_v20 = vld [vmem:[%s3475_s0 + $0x38] sm:$0xff]   ;;  %v2381_v22 = vld [vmem:[%s3475_s0 + $0x40] sm:$0xff]  }
   0x7   :  { %2213 = vmatpush3.bf16.msra.mxu0 %v763_v6  ;;  %2361 = vmatpush3.bf16.msra.mxu1 %v763_v6  ;;  %v2380_v21 = vld [vmem:[%s3475_s0 + $0x158] sm:$0xff]   ;;  %v2383_v23 = vld [vmem:[%s3475_s0 + $0x160] sm:$0xff]   ;;  %v2382_v24 = vld [vmem:[%s3475_s0 + $0x48] sm:$0xff]  }
   0x8   :  { %v2384_v25 = vld [vmem:[%s3475_s0 + $0x168] sm:$0xff]   ;;  %v2385_v26 = vld [vmem:[%s3475_s0 + $0x50] sm:$0xff]   ;;  %v2386_v28 = vld [vmem:[%s3475_s0 + $0x58] sm:$0xff]  }
   0x9   :  { %v2387_v27 = vld [vmem:[%s3475_s0 + $0x170] sm:$0xff]   ;;  %v2388_v29 = vld [vmem:[%s3475_s0 + $0x178] sm:$0xff]   ;;  %v2389_v30 = vld [vmem:[%s3475_s0 + $0x60] sm:$0xff]  }
   0xa   :  { %2215 = vmatmul.mubr.msk.bf16.vlgmr.msra.gmra.mrb[0].mxu0 %vm541_vm2, %v2366_v8  ;;  %2287 = vmatmul.mubr.msk.bf16.vlgmr.msra.gmra.mrb[0].mxu1 %vm541_vm2, %v2368_v9  ;;  %v2391_v31 = vld [vmem:[%s3475_s0 + $0x180] sm:$0xff]   ;;  %v2390_v32 = vld [vmem:[%s3475_s0 + $0x68] sm:$0xff]   ;;  %v2393_v34 = vld [vmem:[%s3475_s0 + $0x70] sm:$0xff]  }
   0xb   :  { %2218 = vmatprep.mubr.msk.bf16.mxu0 %vm541_vm2, %v2369_v10  ;;  %2290 = vmatprep.mubr.msk.bf16.mxu1 %vm541_vm2, %v2371_v11  ;;  %v2392_v33 = vld [vmem:[%s3475_s0 + $0x188] sm:$0xff]   ;;  %v2395_v35 = vld [vmem:[%s3475_s0 + $0x190] sm:$0xff]   ;;  %v2394_v36 = vld [vmem:[%s3475_s0 + $0x78] sm:$0xff]  }
   0xc   :  { %v2396_v37 = vld [vmem:[%s3475_s0 + $0x198] sm:$0xff]   ;;  %v2397_v38 = vld [vmem:[%s3475_s0 + $0x80] sm:$0xff]   ;;  %v2398_v40 = vld [vmem:[%s3475_s0 + $0x88] sm:$0xff]  }
   0xd   :  { %v2399_v39 = vld [vmem:[%s3475_s0 + $0x1a0] sm:$0xff]   ;;  %v2400_v41 = vld [vmem:[%s3475_s0 + $0x1a8] sm:$0xff]   ;;  %v2401_v42 = vld [vmem:[%s3475_s0 + $0x90] sm:$0xff]  }
   0xe   :  { %v2403_v43 = vld [vmem:[%s3475_s0 + $0x1b0] sm:$0xff]   ;;  %v2402_v44 = vld [vmem:[%s3475_s0 + $0x98] sm:$0xff]   ;;  %v2405_v46 = vld [vmem:[%s3475_s0 + $0xa0] sm:$0xff]  }
   0xf   :  { %v2404_v45 = vld [vmem:[%s3475_s0 + $0x1b8] sm:$0xff]   ;;  %v2407_v47 = vld [vmem:[%s3475_s0 + $0x1c0] sm:$0xff]   ;;  %v2406_v48 = vld [vmem:[%s3475_s0 + $0xa8] sm:$0xff]  }
  0x10   :  { %v2408_v49 = vld [vmem:[%s3475_s0 + $0x1c8] sm:$0xff]   ;;  %v2409_v50 = vld [vmem:[%s3475_s0 + $0xb0] sm:$0xff]   ;;  %v2410_v52 = vld [vmem:[%s3475_s0 + $0xb8] sm:$0xff]  }
  0x11   :  { %v2411_v51 = vld [vmem:[%s3475_s0 + $0x1d0] sm:$0xff]   ;;  %v2412_v53 = vld [vmem:[%s3475_s0 + $0x1d8] sm:$0xff]   ;;  %v2413_v54 = vld [vmem:[%s3475_s0 + $0xc0] sm:$0xff]  }
  0x12   :  { %2219 = vmatmul.mubr.msk.bf16.gmra.mrb[4].mxu0 %vm541_vm2, %v2370_v12  ;;  %2291 = vmatmul.mubr.msk.bf16.gmra.mrb[4].mxu1 %vm541_vm2, %v2372_v13  ;;  %v2415_v55 = vld [vmem:[%s3475_s0 + $0x1e0] sm:$0xff]   ;;  %v2414_v56 = vld [vmem:[%s3475_s0 + $0xc8] sm:$0xff]   ;;  %v2417_v58 = vld [vmem:[%s3475_s0 + $0xd0] sm:$0xff]  }
  0x13   :  { %2222 = vmatprep.mubr.msk.bf16.mxu0 %vm541_vm2, %v2373_v14  ;;  %2294 = vmatprep.mubr.msk.bf16.mxu1 %vm541_vm2, %v2375_v15  ;;  %v2416_v57 = vld [vmem:[%s3475_s0 + $0x1e8] sm:$0xff]   ;;  %v2419_v59 = vld [vmem:[%s3475_s0 + $0x1f0] sm:$0xff]   ;;  %v2418_v60 = vld [vmem:[%s3475_s0 + $0xd8] sm:$0xff]  }
  0x14   :  { %v2420_v61 = vld [vmem:[%s3475_s0 + $0x1f8] sm:$0xff]   ;;  %v2421_v62 = vld [vmem:[%s3475_s0 + $0xe0] sm:$0xff]   ;;  %v2422_v0 = vld [vmem:[%s3475_s0 + $0xe8] sm:$0xff]  }
  0x15   :  { %v2423_v63 = vld [vmem:[%s3475_s0 + $0x200] sm:$0xff]   ;;  %v2424_v1 = vld [vmem:[%s3475_s0 + $0x208] sm:$0xff]   ;;  %v2425_v2 = vld [vmem:[%s3475_s0 + $0xf0] sm:$0xff]  }
  0x16   :  { %v2427_v3 = vld [vmem:[%s3475_s0 + $0x210] sm:$0xff]   ;;  %v2426_v4 = vld [vmem:[%s3475_s0 + $0xf8] sm:$0xff]   ;;  %v2429_v6 = vld [vmem:[%s3475_s0 + $0x100] sm:$0xff]  }
  0x17   :  { %v2428_v5 = vld [vmem:[%s3475_s0 + $0x218] sm:$0xff]   ;;  %v2431_v7 = vld [vmem:[%s3475_s0 + $0x220] sm:$0xff]   ;;  %v2430_v8 = vld [vmem:[%s3475_s0 + $0x108] sm:$0xff]  }
  0x18   :  { %v2432_v9 = vld [vmem:[%s3475_s0 + $0x228] sm:$0xff]   ;;  %v2433_v10 = vld [vmem:[%s3475_s0 + $0x110] sm:$0xff]   ;;  %v2434_v12 = vld [vmem:[%s3475_s0 + $0x118] sm:$0xff]  }
  0x19   :  { %v2435_v11 = vld [vmem:[%s3475_s0 + $0x230] sm:$0xff]   ;;  %v2436_v13 = vld [vmem:[%s3475_s0 + $0x238] sm:$0xff]  }
  0x1a   :  { %2223 = vmatmul.mubr.msk.bf16.gmra.mrb[8].mxu0 %vm541_vm2, %v2374_v16  ;;  %2295 = vmatmul.mubr.msk.bf16.gmra.mrb[8].mxu1 %vm541_vm2, %v2376_v17 }
  0x1b   :  { %2226 = vmatprep.mubr.msk.bf16.mxu0 %vm541_vm2, %v2377_v18  ;;  %2298 = vmatprep.mubr.msk.bf16.mxu1 %vm541_vm2, %v2379_v19 }
  0x22   :  { %2227 = vmatmul.mubr.msk.bf16.gmra.mrb[12].mxu0 %vm541_vm2, %v2378_v20  ;;  %2299 = vmatmul.mubr.msk.bf16.gmra.mrb[12].mxu1 %vm541_vm2, %v2380_v21 }
  0x23   :  { %2230 = vmatprep.mubr.msk.bf16.mxu0 %vm541_vm2, %v2381_v22  ;;  %2302 = vmatprep.mubr.msk.bf16.mxu1 %vm541_vm2, %v2383_v23 }
  0x2a   :  { %2231 = vmatmul.mubr.msk.bf16.gmra.mrb[16].mxu0 %vm541_vm2, %v2382_v24  ;;  %2303 = vmatmul.mubr.msk.bf16.gmra.mrb[16].mxu1 %vm541_vm2, %v2384_v25 }
  0x2b   :  { %2234 = vmatprep.mubr.msk.bf16.mxu0 %vm541_vm2, %v2385_v26  ;;  %2306 = vmatprep.mubr.msk.bf16.mxu1 %vm541_vm2, %v2387_v27 }
  0x32   :  { %2235 = vmatmul.mubr.msk.bf16.gmra.mrb[20].mxu0 %vm541_vm2, %v2386_v28  ;;  %2307 = vmatmul.mubr.msk.bf16.gmra.mrb[20].mxu1 %vm541_vm2, %v2388_v29 }
  0x33   :  { %2238 = vmatprep.mubr.msk.bf16.mxu0 %vm541_vm2, %v2389_v30  ;;  %2310 = vmatprep.mubr.msk.bf16.mxu1 %vm541_vm2, %v2391_v31 }
  0x3a   :  { %2239 = vmatmul.mubr.msk.bf16.gmra.mrb[24].mxu0 %vm541_vm2, %v2390_v32  ;;  %2311 = vmatmul.mubr.msk.bf16.gmra.mrb[24].mxu1 %vm541_vm2, %v2392_v33 }
  0x3b   :  { %2242 = vmatprep.mubr.msk.bf16.mxu0 %vm541_vm2, %v2393_v34  ;;  %2314 = vmatprep.mubr.msk.bf16.mxu1 %vm541_vm2, %v2395_v35 }
  0x42   :  { %2243 = vmatmul.mubr.msk.bf16.gmra.mrb[28].mxu0 %vm541_vm2, %v2394_v36  ;;  %2315 = vmatmul.mubr.msk.bf16.gmra.mrb[28].mxu1 %vm541_vm2, %v2396_v37 }
  0x43   :  { %2246 = vmatprep.mubr.msk.bf16.mxu0 %vm541_vm2, %v2397_v38  ;;  %2318 = vmatprep.mubr.msk.bf16.mxu1 %vm541_vm2, %v2399_v39 }
  0x4a   :  { %2247 = vmatmul.mubr.msk.bf16.gmra.mrb[32].mxu0 %vm541_vm2, %v2398_v40  ;;  %2319 = vmatmul.mubr.msk.bf16.gmra.mrb[32].mxu1 %vm541_vm2, %v2400_v41 }
  0x4b   :  { %2250 = vmatprep.mubr.msk.bf16.mxu0 %vm541_vm2, %v2401_v42  ;;  %2322 = vmatprep.mubr.msk.bf16.mxu1 %vm541_vm2, %v2403_v43 }
  0x52   :  { %2251 = vmatmul.mubr.msk.bf16.gmra.mrb[36].mxu0 %vm541_vm2, %v2402_v44  ;;  %2323 = vmatmul.mubr.msk.bf16.gmra.mrb[36].mxu1 %vm541_vm2, %v2404_v45 }
  0x53   :  { %2254 = vmatprep.mubr.msk.bf16.mxu0 %vm541_vm2, %v2405_v46  ;;  %2326 = vmatprep.mubr.msk.bf16.mxu1 %vm541_vm2, %v2407_v47 }
  0x5a   :  { %2255 = vmatmul.mubr.msk.bf16.gmra.mrb[40].mxu0 %vm541_vm2, %v2406_v48  ;;  %2327 = vmatmul.mubr.msk.bf16.gmra.mrb[40].mxu1 %vm541_vm2, %v2408_v49 }
  0x5b   :  { %2258 = vmatprep.mubr.msk.bf16.mxu0 %vm541_vm2, %v2409_v50  ;;  %2330 = vmatprep.mubr.msk.bf16.mxu1 %vm541_vm2, %v2411_v51 }
  0x62   :  { %2259 = vmatmul.mubr.msk.bf16.gmra.mrb[44].mxu0 %vm541_vm2, %v2410_v52  ;;  %2331 = vmatmul.mubr.msk.bf16.gmra.mrb[44].mxu1 %vm541_vm2, %v2412_v53 }
  0x63   :  { %2262 = vmatprep.mubr.msk.bf16.mxu0 %vm541_vm2, %v2413_v54  ;;  %2334 = vmatprep.mubr.msk.bf16.mxu1 %vm541_vm2, %v2415_v55  ;;  %v2806_v54 = vld [vmem:[%s3476_s2] ss:$0 sm:$0xff] }
  0x6a   :  { %2263 = vmatmul.mubr.msk.bf16.gmra.mrb[48].mxu0 %vm541_vm2, %v2414_v56  ;;  %2335 = vmatmul.mubr.msk.bf16.gmra.mrb[48].mxu1 %vm541_vm2, %v2416_v57 }
  0x6b   :  { %2266 = vmatprep.mubr.msk.bf16.mxu0 %vm541_vm2, %v2417_v58  ;;  %2338 = vmatprep.mubr.msk.bf16.mxu1 %vm541_vm2, %v2419_v59 }
  0x72   :  { %2267 = vmatmul.mubr.msk.bf16.gmra.mrb[52].mxu0 %vm541_vm2, %v2418_v60  ;;  %2339 = vmatmul.mubr.msk.bf16.gmra.mrb[52].mxu1 %vm541_vm2, %v2420_v61 }
  0x73   :  { %2270 = vmatprep.mubr.msk.bf16.mxu0 %vm541_vm2, %v2421_v62  ;;  %2342 = vmatprep.mubr.msk.bf16.mxu1 %vm541_vm2, %v2423_v63 }
  0x7a   :  { %2271 = vmatmul.mubr.msk.bf16.gmra.mrb[56].mxu0 %vm541_vm2, %v2422_v0  ;;  %2343 = vmatmul.mubr.msk.bf16.gmra.mrb[56].mxu1 %vm541_vm2, %v2424_v1 }
  0x7b   :  { %2274 = vmatprep.mubr.msk.bf16.mxu0 %vm541_vm2, %v2425_v2  ;;  %2346 = vmatprep.mubr.msk.bf16.mxu1 %vm541_vm2, %v2427_v3 }
  0x82   :  { %2275 = vmatmul.mubr.msk.bf16.gmra.mrb[60].mxu0 %vm541_vm2, %v2426_v4  ;;  %2347 = vmatmul.mubr.msk.bf16.gmra.mrb[60].mxu1 %vm541_vm2, %v2428_v5 }
  0x83   :  { %2278 = vmatprep.mubr.msk.bf16.mxu0 %vm541_vm2, %v2429_v6  ;;  %2350 = vmatprep.mubr.msk.bf16.mxu1 %vm541_vm2, %v2431_v7 }
  0x8a   :  { %2279 = vmatmul.mubr.msk.bf16.gmra.mrb[64].mxu0 %vm541_vm2, %v2430_v8  ;;  %2351 = vmatmul.mubr.msk.bf16.gmra.mrb[64].mxu1 %vm541_vm2, %v2432_v9 }
  0x8b   :  { %2282 = vmatprep.mubr.msk.bf16.mxu0 %vm541_vm2, %v2433_v10  ;;  %2354 = vmatprep.mubr.msk.bf16.mxu1 %vm541_vm2, %v2435_v11 }
  0x92   :  { %2283 = vmatmul.mubr.msk.bf16.gmra.mrb[68].mxu0 %vm541_vm2, %v2434_v12  ;;  %2355 = vmatmul.mubr.msk.bf16.gmra.mrb[68].mxu1 %vm541_vm2, %v2436_v13 }
  0xdd   :  { %v2216_v14 = vpop.f32.mrb[0].mxu0  ;;  %v2288_v15 = vpop.f32.mrb[0].mxu1 }
  0xde   :  { %v799_v16 = vpop.f32.mrb[1].mxu0  ;;  %v1087_v17 = vpop.f32.mrb[1].mxu1  ;;  %v2817_v59 = vadd.f32 %v2216_v14, %v2806_v54  ;;  %v2820_v60 = vadd.f32 %v2288_v15, %v2806_v54 }
  0xdf   :  { %v2217_v18 = vpop.f32.mrb[2].mxu0  ;;  %v2289_v19 = vpop.f32.mrb[2].mxu1  ;;  %v2827_v63 = vadd.f32 %v2806_v54, %v799_v16  ;;  %v2833_v1 = vadd.f32 %v2806_v54, %v1087_v17 }
  0xe0   :  { %v802_v20 = vpop.f32.mrb[3].mxu0  ;;  %v1090_v21 = vpop.f32.mrb[3].mxu1  ;;  %v2830_v0 = vadd.f32 %v2217_v18, %v2806_v54  ;;  %v2836_v2 = vadd.f32 %v2289_v19, %v2806_v54 }
  0xe1   :  { %v2843_v5 = vadd.f32 %v2806_v54, %v802_v20  ;;  %v2846_v6 = vadd.f32 %v2806_v54, %v1090_v21 }
  0xe5   :  { %v2220_v22 = vpop.f32.mrb[4].mxu0  ;;  %v2292_v23 = vpop.f32.mrb[4].mxu1 }
  0xe6   :  { %v815_v24 = vpop.f32.mrb[5].mxu0  ;;  %v1103_v25 = vpop.f32.mrb[5].mxu1  ;;  %v2849_v7 = vadd.f32 %v2220_v22, %v2806_v54  ;;  %v2852_v8 = vadd.f32 %v2292_v23, %v2806_v54 }
  0xe7   :  { %v2221_v26 = vpop.f32.mrb[6].mxu0  ;;  %v2753_v27 = vpop.f32.mrb[6].mxu1  ;;  %v2857_v11 = vadd.f32 %v2806_v54, %v815_v24  ;;  %v2860_v12 = vadd.f32 %v2806_v54, %v1103_v25 }
  0xe8   :  { %v818_v28 = vpop.f32.mrb[7].mxu0  ;;  %v1106_v29 = vpop.f32.mrb[7].mxu1  ;;  %v2875_v23 = vadd.f32 %v2221_v26, %v2806_v54  ;;  %v2882_v25 = vadd.f32 %v2753_v27, %v2806_v54 }
  0xe9   :  { %3507 = vst [vmem:[#allocation2_spill] sm:$0xff] %v2860_v12  ;;  %v2878_v24 = vadd.f32 %v2806_v54, %v818_v28  ;;  %v2885_v18 = vadd.f32 %v2806_v54, %v1106_v29 }
  0xeb   :  { %3508 = vst [vmem:[#allocation3_spill] sm:$0xff] %v2885_v18 }
  0xed   :  { %v2755_v30 = vpop.f32.mrb[8].mxu0  ;;  %v2757_v31 = vpop.f32.mrb[8].mxu1 }
  0xee   :  { %v2759_v32 = vpop.f32.mrb[9].mxu0  ;;  %v2761_v33 = vpop.f32.mrb[9].mxu1  ;;  %v2895_v26 = vadd.f32 %v2755_v30, %v2806_v54  ;;  %v2899_v28 = vadd.f32 %v2757_v31, %v2806_v54 }
  0xef   :  { %v2763_v34 = vpop.f32.mrb[10].mxu0  ;;  %v2765_v35 = vpop.f32.mrb[10].mxu1  ;;  %v2907_v15 = vadd.f32 %v2806_v54, %v2759_v32  ;;  %v2915_v30 = vadd.f32 %v2806_v54, %v2761_v33 }
  0xf0   :  { %v2767_v36 = vpop.f32.mrb[11].mxu0  ;;  %v2769_v37 = vpop.f32.mrb[11].mxu1  ;;  %3509 = vst [vmem:[#allocation4_spill] sm:$0xff] %v2895_v26  ;;  %3510 = vst [vmem:[#allocation5_spill] sm:$0xff] %v2899_v28  ;;  %v2911_v16 = vadd.f32 %v2763_v34, %v2806_v54  ;;  %v2919_v31 = vadd.f32 %v2765_v35, %v2806_v54 }
  0xf1   :  { %v2927_v32 = vadd.f32 %v2806_v54, %v2767_v36  ;;  %v2931_v34 = vadd.f32 %v2806_v54, %v2769_v37 }
  0xf3   :  { %3511 = vst [vmem:[#allocation6_spill] sm:$0xff] %v2931_v34 }
  0xf5   :  { %v2771_v38 = vpop.f32.mrb[12].mxu0  ;;  %v2773_v39 = vpop.f32.mrb[12].mxu1 }
  0xf6   :  { %v2775_v40 = vpop.f32.mrb[13].mxu0  ;;  %v2777_v41 = vpop.f32.mrb[13].mxu1  ;;  %v2935_v33 = vadd.f32 %v2771_v38, %v2806_v54  ;;  %v2939_v35 = vadd.f32 %v2773_v39, %v2806_v54 }
  0xf7   :  { %v2779_v42 = vpop.f32.mrb[14].mxu0  ;;  %v2781_v43 = vpop.f32.mrb[14].mxu1  ;;  %v2949_v38 = vadd.f32 %v2806_v54, %v2775_v40  ;;  %v2953_v39 = vadd.f32 %v2806_v54, %v2777_v41 }
  0xf8   :  { %v2783_v44 = vpop.f32.mrb[15].mxu0  ;;  %v2785_v45 = vpop.f32.mrb[15].mxu1  ;;  %3512 = vst [vmem:[#allocation7_spill] sm:$0xff] %v2935_v33  ;;  %3513 = vst [vmem:[#allocation8_spill] sm:$0xff] %v2939_v35  ;;  %v2965_v41 = vadd.f32 %v2779_v42, %v2806_v54  ;;  %v2973_v36 = vadd.f32 %v2781_v43, %v2806_v54 }
  0xf9   :  { %3514 = vst [vmem:[#allocation9_spill] sm:$0xff] %v2949_v38  ;;  %3515 = vst [vmem:[#allocation10_spill] sm:$0xff] %v2953_v39  ;;  %v2969_v13 = vadd.f32 %v2806_v54, %v2783_v44  ;;  %v2977_v37 = vadd.f32 %v2806_v54, %v2785_v45 }
  0xfd   :  { %v2787_v46 = vpop.f32.mrb[16].mxu0  ;;  %v2789_v47 = vpop.f32.mrb[16].mxu1 }
  0xfe   :  { %v2791_v48 = vpop.f32.mrb[17].mxu0  ;;  %v2793_v49 = vpop.f32.mrb[17].mxu1  ;;  %v2987_v44 = vadd.f32 %v2787_v46, %v2806_v54  ;;  %v2991_v43 = vadd.f32 %v2789_v47, %v2806_v54 }
  0xff   :  { %v2795_v50 = vpop.f32.mrb[18].mxu0  ;;  %v2797_v51 = vpop.f32.mrb[18].mxu1  ;;  %v2999_v10 = vadd.f32 %v2806_v54, %v2791_v48  ;;  %v3007_v46 = vadd.f32 %v2806_v54, %v2793_v49 }
 0x100   :  { %v2799_v52 = vpop.f32.mrb[19].mxu0  ;;  %v2801_v53 = vpop.f32.mrb[19].mxu1  ;;  %3516 = vst [vmem:[#allocation11_spill] sm:$0xff] %v2987_v44  ;;  %3517 = vst [vmem:[#allocation12_spill] sm:$0xff] %v2991_v43  ;;  %v3003_v12 = vadd.f32 %v2795_v50, %v2806_v54  ;;  %v3011_v47 = vadd.f32 %v2797_v51, %v2806_v54 }
 0x101   :  { %v3019_v48 = vadd.f32 %v2806_v54, %v2799_v52  ;;  %v3023_v50 = vadd.f32 %v2806_v54, %v2801_v53 }
 0x103   :  { %3518 = vst [vmem:[#allocation13_spill] sm:$0xff] %v3023_v50 }
 0x105   :  { %v2808_v55 = vpop.f32.mrb[20].mxu0  ;;  %v2810_v56 = vpop.f32.mrb[20].mxu1 }
 0x106   :  { %v2812_v57 = vpop.f32.mrb[21].mxu0  ;;  %v2814_v58 = vpop.f32.mrb[21].mxu1  ;;  %v3027_v49 = vadd.f32 %v2808_v55, %v2806_v54  ;;  %v3031_v51 = vadd.f32 %v2810_v56, %v2806_v54 }
 0x107   :  { %v2822_v61 = vpop.f32.mrb[22].mxu0  ;;  %v2824_v62 = vpop.f32.mrb[22].mxu1  ;;  %v3041_v55 = vadd.f32 %v2806_v54, %v2812_v57  ;;  %v3045_v56 = vadd.f32 %v2806_v54, %v2814_v58 }
 0x108   :  { %v2838_v3 = vpop.f32.mrb[23].mxu0  ;;  %v2840_v4 = vpop.f32.mrb[23].mxu1  ;;  %3519 = vst [vmem:[#allocation14_spill] sm:$0xff] %v3027_v49  ;;  %3520 = vst [vmem:[#allocation15_spill] sm:$0xff] %v3031_v51  ;;  %v3061_v35 = vadd.f32 %v2822_v61, %v2806_v54  ;;  %v3069_v52 = vadd.f32 %v2824_v62, %v2806_v54 }
 0x109   :  { %3521 = vst [vmem:[#allocation16_spill] sm:$0xff] %v3041_v55  ;;  %3522 = vst [vmem:[#allocation17_spill] sm:$0xff] %v3045_v56  ;;  %v3065_v33 = vadd.f32 %v2806_v54, %v2838_v3  ;;  %v3073_v43 = vadd.f32 %v2806_v54, %v2840_v4 }
 0x10b   :  { %3523 = vst [vmem:[#allocation18_spill] sm:$0xff] %v3073_v43 }
 0x10d   :  { %v2870_v21 = vpop.f32.mrb[24].mxu0  ;;  %v2872_v22 = vpop.f32.mrb[24].mxu1 }
 0x10e   :  { %v2887_v19 = vpop.f32.mrb[25].mxu0  ;;  %v2889_v20 = vpop.f32.mrb[25].mxu1  ;;  %v3083_v3 = vadd.f32 %v2870_v21, %v2806_v54  ;;  %v3087_v62 = vadd.f32 %v2872_v22, %v2806_v54 }
 0x10f   :  { %v2901_v27 = vpop.f32.mrb[26].mxu0  ;;  %v2903_v29 = vpop.f32.mrb[26].mxu1  ;;  %v3095_v51 = vadd.f32 %v2806_v54, %v2887_v19  ;;  %v3103_v21 = vadd.f32 %v2806_v54, %v2889_v20 }
 0x110   :  { %v2921_v17 = vpop.f32.mrb[27].mxu0  ;;  %v2923_v14 = vpop.f32.mrb[27].mxu1  ;;  %3524 = vst [vmem:[#allocation19_spill] sm:$0xff] %v3083_v3  ;;  %3525 = vst [vmem:[#allocation20_spill] sm:$0xff] %v3087_v62  ;;  %v3099_v34 = vadd.f32 %v2901_v27, %v2806_v54  ;;  %v3107_v22 = vadd.f32 %v2903_v29, %v2806_v54 }
 0x111   :  { %3526 = vst [vmem:[#allocation21_spill] sm:$0xff] %v3095_v51  ;;  %3528 = vst [vmem:[#allocation23_spill] sm:$0xff] %v3103_v21  ;;  %v3115_v19 = vadd.f32 %v2806_v54, %v2921_v17  ;;  %v3119_v27 = vadd.f32 %v2806_v54, %v2923_v14 }
 0x112   :  { %3527 = vst [vmem:[#allocation22_spill] sm:$0xff] %v3099_v34  ;;  %3529 = vst [vmem:[#allocation24_spill] sm:$0xff] %v3107_v22  ;;  %v3541_v22 = vmax.f32 %v2830_v0, 0.0 }
 0x113   :  { %3532 = vst [vmem:[#allocation27_spill] sm:$0xff] %v3115_v19  ;;  %3533 = vst [vmem:[#allocation28_spill] sm:$0xff] %v3119_v27 }
 0x115   :  { %v2244_v26 = vpop.f32.mrb[28].mxu0  ;;  %v2316_v18 = vpop.f32.mrb[28].mxu1 }
 0x116   :  { %v2979_v28 = vpop.f32.mrb[29].mxu0  ;;  %v2981_v40 = vpop.f32.mrb[29].mxu1  ;;  %v3122_v55 = vadd.f32 %v2244_v26, %v2806_v54  ;;  %v3125_v20 = vadd.f32 %v2316_v18, %v2806_v54 }
 0x117   :  { %v2993_v9 = vpop.f32.mrb[30].mxu0  ;;  %v2995_v45 = vpop.f32.mrb[30].mxu1  ;;  %v3135_v14 = vadd.f32 %v2806_v54, %v2979_v28  ;;  %v3139_v18 = vadd.f32 %v2806_v54, %v2981_v40 }
 0x118   :  { %v3013_v42 = vpop.f32.mrb[31].mxu0  ;;  %v3015_v39 = vpop.f32.mrb[31].mxu1  ;;  %3534 = vst [vmem:[#allocation29_spill] sm:$0xff] %v3122_v55  ;;  %3535 = vst [vmem:[#allocation30_spill] sm:$0xff] %v3125_v20  ;;  %v3151_v40 = vadd.f32 %v2993_v9, %v2806_v54 }
 0x119   :  { %3536 = vst [vmem:[#allocation31_spill] sm:$0xff] %v3135_v14  ;;  %3537 = vst [vmem:[#allocation32_spill] sm:$0xff] %v3139_v18 }
 0x11d   :  { %v3055_v44 = vpop.f32.mrb[32].mxu0  ;;  %v3057_v58 = vpop.f32.mrb[32].mxu1 }
 0x11e   :  { %v3075_v57 = vpop.f32.mrb[33].mxu0  ;;  %v3077_v53 = vpop.f32.mrb[33].mxu1 }
 0x11f   :  { %v3089_v38 = vpop.f32.mrb[34].mxu0  ;;  %v3091_v4 = vpop.f32.mrb[34].mxu1 }
 0x120   :  { %v3109_v61 = vpop.f32.mrb[35].mxu0  ;;  %v3111_v56 = vpop.f32.mrb[35].mxu1 }
 0x121   :  { %3530 = vst [vmem:[#allocation25_spill] sm:$0xff] %v3109_v61  ;;  %3531 = vst [vmem:[#allocation26_spill] sm:$0xff] %v3111_v56  ;;  %v3155_v61 = vadd.f32 %v2995_v45, %v2806_v54  ;;  %v3165_v45 = vadd.f32 %v2806_v54, %v3013_v42  ;;  %v3538_v42 = vmax.f32 %v2817_v59, 0.0 }
 0x125   :  { %v2252_v62 = vpop.f32.mrb[36].mxu0  ;;  %v2324_v3 = vpop.f32.mrb[36].mxu1 }
 0x126   :  { %v952_v49 = vadd.f32 %v2252_v62, %v2806_v54  ;;  %v943_v56 = vpop.f32.mrb[37].mxu0  ;;  %v1240_v17 = vadd.f32 %v2324_v3, %v2806_v54  ;;  %v1231_v50 = vpop.f32.mrb[37].mxu1  ;;  %v3169_v62 = vadd.f32 %v2806_v54, %v3015_v39 }
 0x127   :  { %v944_v26 = vadd.f32 %v2806_v54, %v943_v56  ;;  %v2253_v20 = vpop.f32.mrb[38].mxu0  ;;  %v1232_v9 = vadd.f32 %v2806_v54, %v1231_v50  ;;  %v2325_v55 = vpop.f32.mrb[38].mxu1 }
 0x128   :  { %v1412_v3 = vmax.f32 %v952_v49, 0.0  ;;  %v955_v27 = vadd.f32 %v2253_v20, %v2806_v54  ;;  %v946_v29 = vpop.f32.mrb[39].mxu0  ;;  %v1234_v14 = vpop.f32.mrb[39].mxu1  ;;  %v1243_v18 = vadd.f32 %v2325_v55, %v2806_v54  ;;  %v1484_v21 = vmax.f32 %v1240_v17, 0.0 }
 0x129   :  { %v1410_v28 = vmax.f32 %v944_v26, 0.0  ;;  %v947_v56 = vadd.f32 %v2806_v54, %v946_v29  ;;  %v1235_v50 = vadd.f32 %v2806_v54, %v1234_v14  ;;  %v3539_v20 = vmax.f32 %v2827_v63, 0.0 }
 0x12a   :  { %v1524_v19 = vmax.f32 %v3538_v42, %v1412_v3  ;;  %v1413_v39 = vmax.f32 %v955_v27, 0.0  ;;  %v1482_v51 = vmax.f32 %v1232_v9, 0.0  ;;  %v1403_v29 = vmax.f32 %v3165_v45, 0.0 }
 0x12b   :  { %v1518_v34 = vmax.f32 %v3539_v20, %v1410_v28  ;;  %v1411_v26 = vmax.f32 %v947_v56, 0.0  ;;  %v3540_v14 = vmax.f32 %v2820_v60, 0.0  ;;  %v3542_v17 = vmax.f32 %v2833_v1, 0.0 }
 0x12c   :  { %v1527_v59 = vmax.f32 %v3541_v22, %v1413_v39  ;;  %v3543_v3 = vmax.f32 %v2843_v5, 0.0  ;;  %v1485_v63 = vmax.f32 %v1243_v18, 0.0  ;;  %v1483_v28 = vmax.f32 %v1235_v50, 0.0 }
 0x12d   :  { %v1525_v43 = vmax.f32 %v1524_v19, %v3540_v14  ;;  %v1519_v27 = vmax.f32 %v1518_v34, %v3542_v17  ;;  %v2256_v9 = vpop.f32.mrb[40].mxu0  ;;  %v2328_v56 = vpop.f32.mrb[40].mxu1  ;;  %v3544_v49 = vmax.f32 %v2836_v2, 0.0  ;;  %v3545_v1 = vmax.f32 %v2846_v6, 0.0 }
 0x12e   :  { %v1521_v42 = vmax.f32 %v3543_v3, %v1411_v26  ;;  %v968_v60 = vadd.f32 %v2256_v9, %v2806_v54  ;;  %v959_v19 = vpop.f32.mrb[41].mxu0  ;;  %v1256_v0 = vadd.f32 %v2328_v56, %v2806_v54  ;;  %v1247_v22 = vpop.f32.mrb[41].mxu1 }
 0x12f   :  { %v1526_v20 = vmax.f32 %v1525_v43, %v1484_v21  ;;  %v1528_v55 = vmax.f32 %v1527_v59, %v3544_v49  ;;  %v1520_v39 = vmax.f32 %v1519_v27, %v1482_v51  ;;  %v960_v5 = vadd.f32 %v2806_v54, %v959_v19  ;;  %v2257_v18 = vpop.f32.mrb[42].mxu0  ;;  %v2329_v26 = vpop.f32.mrb[42].mxu1 }
 0x130   :  { %v1522_v34 = vmax.f32 %v1521_v42, %v3545_v1  ;;  %v1248_v50 = vadd.f32 %v2806_v54, %v1247_v22  ;;  %v1416_v21 = vmax.f32 %v968_v60, 0.0  ;;  %v1488_v2 = vmax.f32 %v1256_v0, 0.0  ;;  %v962_v14 = vpop.f32.mrb[43].mxu0  ;;  %v1250_v59 = vpop.f32.mrb[43].mxu1 }
 0x131   :  { %v1529_v43 = vmax.f32 %v1528_v55, %v1485_v63  ;;  %v971_v49 = vadd.f32 %v2257_v18, %v2806_v54  ;;  %v1414_v3 = vmax.f32 %v960_v5, 0.0  ;;  %v963_v51 = vadd.f32 %v2806_v54, %v962_v14 }
 0x132   :  { %v1523_v17 = vmax.f32 %v1522_v34, %v1483_v28  ;;  %v1486_v9 = vmax.f32 %v1248_v50, 0.0  ;;  %v3546_v27 = vmax.f32 %v2849_v7, 0.0  ;;  %v1259_v19 = vadd.f32 %v2329_v26, %v2806_v54 }
 0x133   :  { %v2037_v6 = vpack.c.bf16 %v1529_v43, %v1526_v20  ;;  %v1417_v56 = vmax.f32 %v971_v49, 0.0  ;;  %v3547_v55 = vmax.f32 %v2857_v11, 0.0  ;;  %v1415_v60 = vmax.f32 %v963_v51, 0.0 }
 0x134   :  { %v1536_v42 = vmax.f32 %v3546_v27, %v1416_v21  ;;  %v2032_v22 = vpack.c.bf16 %v1523_v17, %v1520_v39  ;;  %v1251_v0 = vadd.f32 %v2806_v54, %v1250_v59  ;;  %v3209_v28 = vadd.f32 %v3055_v44, %v2806_v54  ;;  %v3550_v44 = vld [vmem:[#allocation2_spill] sm:$0xff] }
 0x135   :  { %v1530_v63 = vmax.f32 %v3547_v55, %v1414_v3  ;;  %v3213_v20 = vadd.f32 %v3057_v58, %v2806_v54  ;;  %2119 = vst [vmem:[%s3477_s3 + $0x8] sm:$0xff] %v2037_v6   ;;  %v3548_v7 = vmax.f32 %v2852_v8, 0.0  ;;  %v3549_v11 = vmax.f32 %v2875_v23, 0.0  ;;  %v2260_v43 = vpop.f32.mrb[44].mxu0  ;;  %v2332_v21 = vpop.f32.mrb[44].mxu1  ;;  %v3554_v6 = vld [vmem:[#allocation3_spill] sm:$0xff] }
 0x136   :  { %2033 = vst [vmem:[%s3477_s3] sm:$0xff] %v2032_v22   ;;  %v3551_v34 = vmax.f32 %v3550_v44, 0.0  ;;  %v3552_v58 = vmax.f32 %v2878_v24, 0.0  ;;  %v1489_v50 = vmax.f32 %v1259_v19, 0.0  ;;  %v1487_v26 = vmax.f32 %v1251_v0, 0.0  ;;  %v975_v59 = vpop.f32.mrb[45].mxu0  ;;  %v1263_v3 = vpop.f32.mrb[45].mxu1 }
 0x137   :  { %v1537_v39 = vmax.f32 %v1536_v42, %v3548_v7  ;;  %v1539_v1 = vmax.f32 %v3549_v11, %v1417_v56  ;;  %v3553_v8 = vmax.f32 %v2882_v25, 0.0  ;;  %v984_v23 = vadd.f32 %v2260_v43, %v2806_v54  ;;  %v2261_v56 = vpop.f32.mrb[46].mxu0  ;;  %v2333_v22 = vpop.f32.mrb[46].mxu1  ;;  %v3556_v44 = vld [vmem:[#allocation4_spill] sm:$0xff] }
 0x138   :  { %v1531_v5 = vmax.f32 %v1530_v63, %v3551_v34  ;;  %v1533_v18 = vmax.f32 %v3552_v58, %v1415_v60  ;;  %v1272_v17 = vadd.f32 %v2332_v21, %v2806_v54  ;;  %v3555_v27 = vmax.f32 %v3554_v6, 0.0  ;;  %v978_v60 = vpop.f32.mrb[47].mxu0  ;;  %v1266_v0 = vpop.f32.mrb[47].mxu1 }
 0x139   :  { %v1538_v49 = vmax.f32 %v1537_v39, %v1488_v2  ;;  %v1540_v14 = vmax.f32 %v1539_v1, %v3553_v8  ;;  %v976_v24 = vadd.f32 %v2806_v54, %v975_v59  ;;  %v1264_v19 = vadd.f32 %v2806_v54, %v1263_v3 }
 0x13a   :  { %v1532_v51 = vmax.f32 %v1531_v5, %v1486_v9  ;;  %v1534_v42 = vmax.f32 %v1533_v18, %v3555_v27  ;;  %v1420_v55 = vmax.f32 %v984_v23, 0.0  ;;  %v1492_v25 = vmax.f32 %v1272_v17, 0.0  ;;  %v3559_v23 = vld [vmem:[#allocation5_spill] sm:$0xff] }
 0x13b   :  { %v1541_v2 = vmax.f32 %v1540_v14, %v1489_v50  ;;  %v987_v63 = vadd.f32 %v2261_v56, %v2806_v54  ;;  %v1418_v39 = vmax.f32 %v976_v24, 0.0  ;;  %v1490_v11 = vmax.f32 %v1264_v19, 0.0 }
 0x13c   :  { %v1535_v7 = vmax.f32 %v1534_v42, %v1487_v26  ;;  %v979_v9 = vadd.f32 %v2806_v54, %v978_v60  ;;  %v3557_v34 = vmax.f32 %v3556_v44, 0.0  ;;  %v1275_v18 = vadd.f32 %v2333_v22, %v2806_v54 }
 0x13d   :  { %v2047_v1 = vpack.c.bf16 %v1541_v2, %v1538_v49  ;;  %v1421_v58 = vmax.f32 %v987_v63, 0.0  ;;  %v3558_v50 = vmax.f32 %v2907_v15, 0.0  ;;  %v1267_v14 = vadd.f32 %v2806_v54, %v1266_v0  ;;  %v2264_v24 = vpop.f32.mrb[48].mxu0  ;;  %v2336_v56 = vpop.f32.mrb[48].mxu1 }
 0x13e   :  { %v1548_v5 = vmax.f32 %v3557_v34, %v1420_v55  ;;  %v2042_v43 = vpack.c.bf16 %v1535_v7, %v1532_v51  ;;  %v1419_v8 = vmax.f32 %v979_v9, 0.0  ;;  %v3247_v26 = vadd.f32 %v2806_v54, %v3075_v57  ;;  %v991_v55 = vpop.f32.mrb[49].mxu0  ;;  %v1279_v60 = vpop.f32.mrb[49].mxu1 }
 0x13f   :  { %v1542_v21 = vmax.f32 %v3558_v50, %v1418_v39  ;;  %v3251_v49 = vadd.f32 %v2806_v54, %v3077_v53  ;;  %2121 = vst [vmem:[%s3477_s3 + $0x18] sm:$0xff] %v2047_v1   ;;  %v3560_v59 = vmax.f32 %v3559_v23, 0.0  ;;  %v3561_v15 = vmax.f32 %v2911_v16, 0.0  ;;  %v2265_v9 = vpop.f32.mrb[50].mxu0  ;;  %v2337_v44 = vpop.f32.mrb[50].mxu1 }
 0x140   :  { %2120 = vst [vmem:[%s3477_s3 + $0x10] sm:$0xff] %v2042_v43   ;;  %v3562_v57 = vmax.f32 %v2915_v30, 0.0  ;;  %v3563_v53 = vmax.f32 %v2927_v32, 0.0  ;;  %v1493_v27 = vmax.f32 %v1275_v18, 0.0  ;;  %v1491_v42 = vmax.f32 %v1267_v14, 0.0  ;;  %v3565_v30 = vld [vmem:[#allocation6_spill] sm:$0xff] }
 0x141   :  { %v1549_v17 = vmax.f32 %v1548_v5, %v3560_v59  ;;  %v1551_v3 = vmax.f32 %v3561_v15, %v1421_v58  ;;  %v3564_v22 = vmax.f32 %v2919_v31, 0.0  ;;  %v1000_v16 = vadd.f32 %v2264_v24, %v2806_v54  ;;  %v994_v58 = vpop.f32.mrb[51].mxu0  ;;  %v1282_v18 = vpop.f32.mrb[51].mxu1  ;;  %v3567_v14 = vld [vmem:[#allocation7_spill] sm:$0xff] }
 0x142   :  { %v1543_v51 = vmax.f32 %v1542_v21, %v3562_v57  ;;  %v1545_v6 = vmax.f32 %v3563_v53, %v1419_v8  ;;  %v1288_v63 = vadd.f32 %v2336_v56, %v2806_v54  ;;  %v3566_v7 = vmax.f32 %v3565_v30, 0.0  ;;  %v3569_v57 = vld [vmem:[#allocation9_spill] sm:$0xff]  ;;  %v3571_v56 = vld [vmem:[#allocation8_spill] sm:$0xff] }
 0x143   :  { %v1550_v19 = vmax.f32 %v1549_v17, %v1492_v25  ;;  %v1552_v2 = vmax.f32 %v1551_v3, %v3564_v22  ;;  %v992_v32 = vadd.f32 %v2806_v54, %v991_v55  ;;  %v1280_v1 = vadd.f32 %v2806_v54, %v1279_v60  ;;  %v3574_v55 = vld [vmem:[#allocation10_spill] sm:$0xff] }
 0x144   :  { %v1544_v0 = vmax.f32 %v1543_v51, %v1490_v11  ;;  %v1546_v39 = vmax.f32 %v1545_v6, %v3566_v7  ;;  %v1424_v34 = vmax.f32 %v1000_v16, 0.0  ;;  %v1496_v31 = vmax.f32 %v1288_v63, 0.0 }
 0x145   :  { %v1553_v25 = vmax.f32 %v1552_v2, %v1493_v27  ;;  %v1003_v5 = vadd.f32 %v2265_v9, %v2806_v54  ;;  %v1422_v50 = vmax.f32 %v992_v32, 0.0  ;;  %v1494_v21 = vmax.f32 %v1280_v1, 0.0  ;;  %v2268_v32 = vpop.f32.mrb[52].mxu0  ;;  %v2340_v9 = vpop.f32.mrb[52].mxu1 }
 0x146   :  { %v1547_v43 = vmax.f32 %v1546_v39, %v1491_v42  ;;  %v995_v11 = vadd.f32 %v2806_v54, %v994_v58  ;;  %v3568_v23 = vmax.f32 %v3567_v14, 0.0  ;;  %v1291_v15 = vadd.f32 %v2337_v44, %v2806_v54  ;;  %v1295_v58 = vpop.f32.mrb[53].mxu1 }
 0x147   :  { %v2057_v8 = vpack.c.bf16 %v1553_v25, %v1550_v19  ;;  %v1425_v17 = vmax.f32 %v1003_v5, 0.0  ;;  %v3570_v51 = vmax.f32 %v3569_v57, 0.0  ;;  %v1283_v27 = vadd.f32 %v2806_v54, %v1282_v18  ;;  %v2341_v14 = vpop.f32.mrb[54].mxu1 }
 0x148   :  { %v1560_v59 = vmax.f32 %v3568_v23, %v1424_v34  ;;  %v2052_v3 = vpack.c.bf16 %v1547_v43, %v1544_v0  ;;  %v1423_v6 = vmax.f32 %v995_v11, 0.0  ;;  %v1408_v42 = vmax.f32 %v3209_v28, 0.0  ;;  %v1007_v34 = vpop.f32.mrb[53].mxu0 }
 0x149   :  { %v1554_v53 = vmax.f32 %v3570_v51, %v1422_v50  ;;  %v1480_v24 = vmax.f32 %v3213_v20, 0.0  ;;  %2123 = vst [vmem:[%s3477_s3 + $0x28] sm:$0xff] %v2057_v8   ;;  %v3572_v19 = vmax.f32 %v3571_v56, 0.0  ;;  %v3573_v2 = vmax.f32 %v2965_v41, 0.0  ;;  %v2269_v11 = vpop.f32.mrb[54].mxu0 }
 0x14a   :  { %2122 = vst [vmem:[%s3477_s3 + $0x20] sm:$0xff] %v2052_v3   ;;  %v3575_v63 = vmax.f32 %v3574_v55, 0.0  ;;  %v3576_v0 = vmax.f32 %v2969_v13, 0.0  ;;  %v1497_v7 = vmax.f32 %v1291_v15, 0.0  ;;  %v1495_v39 = vmax.f32 %v1283_v27, 0.0  ;;  %v1298_v15 = vpop.f32.mrb[55].mxu1 }
 0x14b   :  { %v1561_v22 = vmax.f32 %v1560_v59, %v3572_v19  ;;  %v1563_v16 = vmax.f32 %v3573_v2, %v1425_v17  ;;  %v3577_v44 = vmax.f32 %v2973_v36, 0.0  ;;  %v1016_v41 = vadd.f32 %v2268_v32, %v2806_v54  ;;  %v1010_v17 = vpop.f32.mrb[55].mxu0 }
 0x14c   :  { %v1555_v60 = vmax.f32 %v1554_v53, %v3575_v63  ;;  %v1557_v30 = vmax.f32 %v3576_v0, %v1423_v6  ;;  %v1304_v5 = vadd.f32 %v2340_v9, %v2806_v54  ;;  %v3578_v43 = vmax.f32 %v2977_v37, 0.0  ;;  %v3579_v53 = vld [vmem:[#allocation11_spill] sm:$0xff] }
 0x14d   :  { %v1562_v1 = vmax.f32 %v1561_v22, %v1496_v31  ;;  %v1564_v25 = vmax.f32 %v1563_v16, %v3577_v44  ;;  %v1008_v13 = vadd.f32 %v2806_v54, %v1007_v34  ;;  %v1296_v8 = vadd.f32 %v2806_v54, %v1295_v58  ;;  %v2344_v34 = vpop.f32.mrb[56].mxu1 }
 0x14e   :  { %v1556_v18 = vmax.f32 %v1555_v60, %v1494_v21  ;;  %v1558_v50 = vmax.f32 %v1557_v30, %v3578_v43  ;;  %v1428_v23 = vmax.f32 %v1016_v41, 0.0  ;;  %v1500_v36 = vmax.f32 %v1304_v5, 0.0  ;;  %v3582_v30 = vld [vmem:[#allocation12_spill] sm:$0xff]  ;;  %v2272_v41 = vpop.f32.mrb[56].mxu0 }
 0x14f   :  { %v1565_v31 = vmax.f32 %v1564_v25, %v1497_v7  ;;  %v1019_v59 = vadd.f32 %v2269_v11, %v2806_v54  ;;  %v1426_v57 = vmax.f32 %v1008_v13, 0.0  ;;  %v1498_v51 = vmax.f32 %v1296_v8, 0.0  ;;  %v1023_v43 = vpop.f32.mrb[57].mxu0  ;;  %v1311_v13 = vpop.f32.mrb[57].mxu1 }
 0x150   :  { %v1559_v3 = vmax.f32 %v1558_v50, %v1495_v39  ;;  %v1011_v21 = vadd.f32 %v2806_v54, %v1010_v17  ;;  %v3580_v6 = vmax.f32 %v3579_v53, 0.0  ;;  %v1307_v19 = vadd.f32 %v2341_v14, %v2806_v54 }
 0x151   :  { %v2067_v37 = vpack.c.bf16 %v1565_v31, %v1562_v1  ;;  %v1429_v56 = vmax.f32 %v1019_v59, 0.0  ;;  %v3581_v2 = vmax.f32 %v2999_v10, 0.0  ;;  %v1299_v63 = vadd.f32 %v2806_v54, %v1298_v15  ;;  %v2273_v31 = vpop.f32.mrb[58].mxu0  ;;  %v2345_v59 = vpop.f32.mrb[58].mxu1 }
 0x152   :  { %v1572_v27 = vmax.f32 %v3580_v6, %v1428_v23  ;;  %v2062_v22 = vpack.c.bf16 %v1559_v3, %v1556_v18  ;;  %v1427_v55 = vmax.f32 %v1011_v21, 0.0  ;;  %v3317_v60 = vadd.f32 %v3089_v38, %v2806_v54  ;;  %v1026_v3 = vpop.f32.mrb[59].mxu0 }
 0x153   :  { %v1566_v16 = vmax.f32 %v3581_v2, %v1426_v57  ;;  %v3321_v0 = vadd.f32 %v3091_v4, %v2806_v54  ;;  %2125 = vst [vmem:[%s3477_s3 + $0x38] sm:$0xff] %v2067_v37   ;;  %v3583_v7 = vmax.f32 %v3582_v30, 0.0  ;;  %v3584_v10 = vmax.f32 %v3003_v12, 0.0  ;;  %v1314_v57 = vpop.f32.mrb[59].mxu1 }
 0x154   :  { %2124 = vst [vmem:[%s3477_s3 + $0x30] sm:$0xff] %v2062_v22   ;;  %v3585_v38 = vmax.f32 %v3007_v46, 0.0  ;;  %v3586_v4 = vmax.f32 %v3019_v48, 0.0  ;;  %v1501_v44 = vmax.f32 %v1307_v19, 0.0  ;;  %v1499_v25 = vmax.f32 %v1299_v63, 0.0  ;;  %v3588_v46 = vld [vmem:[#allocation13_spill] sm:$0xff] }
 0x155   :  { %v1573_v39 = vmax.f32 %v1572_v27, %v3583_v7  ;;  %v1575_v32 = vmax.f32 %v3584_v10, %v1429_v56  ;;  %v3587_v58 = vmax.f32 %v3011_v47, 0.0  ;;  %v1032_v12 = vadd.f32 %v2272_v41, %v2806_v54  ;;  %v3590_v27 = vld [vmem:[#allocation14_spill] sm:$0xff] }
 0x156   :  { %v1567_v9 = vmax.f32 %v1566_v16, %v3585_v38  ;;  %v1569_v1 = vmax.f32 %v3586_v4, %v1427_v55  ;;  %v1320_v50 = vadd.f32 %v2344_v34, %v2806_v54  ;;  %v3589_v8 = vmax.f32 %v3588_v46, 0.0  ;;  %v3592_v55 = vld [vmem:[#allocation16_spill] sm:$0xff]  ;;  %v3594_v38 = vld [vmem:[#allocation15_spill] sm:$0xff] }
 0x157   :  { %v1574_v5 = vmax.f32 %v1573_v39, %v1500_v36  ;;  %v1576_v18 = vmax.f32 %v1575_v32, %v3587_v58  ;;  %v1024_v48 = vadd.f32 %v2806_v54, %v1023_v43  ;;  %v1312_v23 = vadd.f32 %v2806_v54, %v1311_v13  ;;  %v2276_v43 = vpop.f32.mrb[60].mxu0 }
 0x158   :  { %v1568_v11 = vmax.f32 %v1567_v9, %v1498_v51  ;;  %v1570_v14 = vmax.f32 %v1569_v1, %v3589_v8  ;;  %v1432_v17 = vmax.f32 %v1032_v12, 0.0  ;;  %v1504_v47 = vmax.f32 %v1320_v50, 0.0  ;;  %v2348_v50 = vpop.f32.mrb[60].mxu1  ;;  %v1039_v8 = vpop.f32.mrb[61].mxu0 }
 0x159   :  { %v1577_v36 = vmax.f32 %v1576_v18, %v1501_v44  ;;  %v1035_v15 = vadd.f32 %v2273_v31, %v2806_v54  ;;  %v1430_v37 = vmax.f32 %v1024_v48, 0.0  ;;  %v1502_v53 = vmax.f32 %v1312_v23, 0.0  ;;  %v1327_v48 = vpop.f32.mrb[61].mxu1  ;;  %v3601_v23 = vld [vmem:[#allocation18_spill] sm:$0xff] }
 0x15a   :  { %v1571_v21 = vmax.f32 %v1570_v14, %v1499_v25  ;;  %v1027_v51 = vadd.f32 %v2806_v54, %v1026_v3  ;;  %v3591_v56 = vmax.f32 %v3590_v27, 0.0  ;;  %v1323_v2 = vadd.f32 %v2345_v59, %v2806_v54  ;;  %v3597_v25 = vld [vmem:[#allocation17_spill] sm:$0xff]  ;;  %v2349_v3 = vpop.f32.mrb[62].mxu1 }
 0x15b   :  { %v2077_v6 = vpack.c.bf16 %v1577_v36, %v1574_v5  ;;  %v1433_v22 = vmax.f32 %v1035_v15, 0.0  ;;  %v3593_v63 = vmax.f32 %v3592_v55, 0.0  ;;  %v1315_v39 = vadd.f32 %v2806_v54, %v1314_v57 }
 0x15c   :  { %v1584_v19 = vmax.f32 %v3591_v56, %v1432_v17  ;;  %v2072_v16 = vpack.c.bf16 %v1571_v21, %v1568_v11  ;;  %v1431_v7 = vmax.f32 %v1027_v51, 0.0  ;;  %v1406_v10 = vmax.f32 %v3247_v26, 0.0  ;;  %v2277_v17 = vpop.f32.mrb[62].mxu0  ;;  %v1330_v51 = vpop.f32.mrb[63].mxu1 }
 0x15d   :  { %v1578_v30 = vmax.f32 %v3593_v63, %v1430_v37  ;;  %v1478_v32 = vmax.f32 %v3251_v49, 0.0  ;;  %2127 = vst [vmem:[%s3477_s3 + $0x48] sm:$0xff] %v2077_v6   ;;  %v3595_v9 = vmax.f32 %v3594_v38, 0.0  ;;  %v3596_v1 = vmax.f32 %v3061_v35, 0.0  ;;  %v1042_v37 = vpop.f32.mrb[63].mxu0 }
 0x15e   :  { %2126 = vst [vmem:[%s3477_s3 + $0x40] sm:$0xff] %v2072_v16   ;;  %v3598_v41 = vmax.f32 %v3597_v25, 0.0  ;;  %v3599_v5 = vmax.f32 %v3065_v33, 0.0  ;;  %v1505_v18 = vmax.f32 %v1323_v2, 0.0  ;;  %v1503_v12 = vmax.f32 %v1315_v39, 0.0  ;;  %v3608_v25 = vld [vmem:[#allocation26_spill] sm:$0xff] }
 0x15f   :  { %v1585_v4 = vmax.f32 %v1584_v19, %v3595_v9  ;;  %v1587_v44 = vmax.f32 %v3596_v1, %v1433_v22  ;;  %v3600_v11 = vmax.f32 %v3069_v52, 0.0  ;;  %v1048_v35 = vadd.f32 %v2276_v43, %v2806_v54  ;;  %v3603_v22 = vld [vmem:[#allocation19_spill] sm:$0xff]  ;;  %v3607_v1 = vld [vmem:[#allocation25_spill] sm:$0xff] }
 0x160   :  { %v1579_v34 = vmax.f32 %v1578_v30, %v3598_v41  ;;  %v1581_v58 = vmax.f32 %v3599_v5, %v1431_v7  ;;  %v1336_v14 = vadd.f32 %v2348_v50, %v2806_v54  ;;  %v3602_v59 = vmax.f32 %v3601_v23, 0.0  ;;  %v3605_v7 = vld [vmem:[#allocation21_spill] sm:$0xff]  ;;  %v3613_v50 = vld [vmem:[#allocation23_spill] sm:$0xff]  ;;  %v2352_v23 = vpop.f32.mrb[64].mxu1 }
 0x161   :  { %v1586_v13 = vmax.f32 %v1585_v4, %v1504_v47  ;;  %v1588_v46 = vmax.f32 %v1587_v44, %v3600_v11  ;;  %v1040_v33 = vadd.f32 %v2806_v54, %v1039_v8  ;;  %v1328_v15 = vadd.f32 %v2806_v54, %v1327_v48 }
 0x162   :  { %v1580_v31 = vmax.f32 %v1579_v34, %v1502_v53  ;;  %v1582_v36 = vmax.f32 %v1581_v58, %v3602_v59  ;;  %v1436_v57 = vmax.f32 %v1048_v35, 0.0  ;;  %v1508_v52 = vmax.f32 %v1336_v14, 0.0  ;;  %v3609_v34 = vld [vmem:[#allocation20_spill] sm:$0xff] }
 0x163   :  { %v1589_v47 = vmax.f32 %v1588_v46, %v1505_v18  ;;  %v1051_v21 = vadd.f32 %v2277_v17, %v2806_v54  ;;  %v1434_v27 = vmax.f32 %v1040_v33, 0.0  ;;  %v1506_v56 = vmax.f32 %v1328_v15, 0.0  ;;  %v3611_v18 = vld [vmem:[#allocation22_spill] sm:$0xff]  ;;  %v3615_v46 = vld [vmem:[#allocation27_spill] sm:$0xff] }
 0x164   :  { %v1583_v6 = vmax.f32 %v1582_v36, %v1503_v12  ;;  %v1043_v53 = vadd.f32 %v2806_v54, %v1042_v37  ;;  %v3604_v2 = vmax.f32 %v3603_v22, 0.0  ;;  %v1339_v63 = vadd.f32 %v2349_v3, %v2806_v54  ;;  %v3617_v36 = vld [vmem:[#allocation24_spill] sm:$0xff] }
 0x165   :  { %v2087_v19 = vpack.c.bf16 %v1589_v47, %v1586_v13  ;;  %v1437_v55 = vmax.f32 %v1051_v21, 0.0  ;;  %v3606_v39 = vmax.f32 %v3605_v7, 0.0  ;;  %v1331_v4 = vadd.f32 %v2806_v54, %v1330_v51  ;;  %v3619_v37 = vld [vmem:[#allocation28_spill] sm:$0xff] }
 0x166   :  { %v1596_v16 = vmax.f32 %v3604_v2, %v1436_v57  ;;  %v2082_v30 = vpack.c.bf16 %v1583_v6, %v1580_v31  ;;  %v1435_v9 = vmax.f32 %v1043_v53, 0.0  ;;  %v3387_v44 = vadd.f32 %v2806_v54, %v3607_v1  ;;  %v2280_v31 = vpop.f32.mrb[64].mxu0  ;;  %v1343_v57 = vpop.f32.mrb[65].mxu1 }
 0x167   :  { %v1590_v38 = vmax.f32 %v3606_v39, %v1434_v27  ;;  %v3391_v41 = vadd.f32 %v2806_v54, %v3608_v25  ;;  %2129 = vst [vmem:[%s3477_s3 + $0x58] sm:$0xff] %v2087_v19   ;;  %v3610_v5 = vmax.f32 %v3609_v34, 0.0  ;;  %v3612_v12 = vmax.f32 %v3611_v18, 0.0  ;;  %v1055_v3 = vpop.f32.mrb[65].mxu0  ;;  %v2353_v22 = vpop.f32.mrb[66].mxu1  ;;  %v3623_v18 = vld [vmem:[#allocation31_spill] sm:$0xff] }
 0x168   :  { %2128 = vst [vmem:[%s3477_s3 + $0x50] sm:$0xff] %v2082_v30   ;;  %v3614_v13 = vmax.f32 %v3613_v50, 0.0  ;;  %v3616_v35 = vmax.f32 %v3615_v46, 0.0  ;;  %v1509_v14 = vmax.f32 %v1339_v63, 0.0  ;;  %v1507_v48 = vmax.f32 %v1331_v4, 0.0  ;;  %v2281_v53 = vpop.f32.mrb[66].mxu0 }
 0x169   :  { %v1597_v58 = vmax.f32 %v1596_v16, %v3610_v5  ;;  %v1599_v43 = vmax.f32 %v3612_v12, %v1437_v55  ;;  %v3618_v33 = vmax.f32 %v3617_v36, 0.0  ;;  %v1064_v15 = vadd.f32 %v2280_v31, %v2806_v54  ;;  %v1058_v63 = vpop.f32.mrb[67].mxu0  ;;  %v1346_v30 = vpop.f32.mrb[67].mxu1  ;;  %v3621_v4 = vld [vmem:[#allocation29_spill] sm:$0xff] }
 0x16a   :  { %v1591_v11 = vmax.f32 %v1590_v38, %v3614_v13  ;;  %v1593_v8 = vmax.f32 %v3616_v35, %v1435_v9  ;;  %v1352_v47 = vadd.f32 %v2352_v23, %v2806_v54  ;;  %v3620_v51 = vmax.f32 %v3619_v37, 0.0  ;;  %v3625_v35 = vld [vmem:[#allocation30_spill] sm:$0xff]  ;;  %v3628_v23 = vld [vmem:[#allocation32_spill] sm:$0xff] }
 0x16b   :  { %v1598_v59 = vmax.f32 %v1597_v58, %v1508_v52  ;;  %v1600_v17 = vmax.f32 %v1599_v43, %v3618_v33  ;;  %v1056_v27 = vadd.f32 %v2806_v54, %v1055_v3  ;;  %v1344_v19 = vadd.f32 %v2806_v54, %v1343_v57 }
 0x16c   :  { %v1592_v21 = vmax.f32 %v1591_v11, %v1506_v56  ;;  %v1594_v6 = vmax.f32 %v1593_v8, %v3620_v51  ;;  %v1440_v2 = vmax.f32 %v1064_v15, 0.0  ;;  %v1512_v16 = vmax.f32 %v1352_v47, 0.0  ;;  %v2356_v15 = vpop.f32.mrb[68].mxu1 }
 0x16d   :  { %v1601_v52 = vmax.f32 %v1600_v17, %v1509_v14  ;;  %v1067_v55 = vadd.f32 %v2281_v53, %v2806_v54  ;;  %v1438_v39 = vmax.f32 %v1056_v27, 0.0  ;;  %v1510_v38 = vmax.f32 %v1344_v19, 0.0  ;;  %v2284_v17 = vpop.f32.mrb[68].mxu0  ;;  %v1359_v51 = vpop.f32.mrb[69].mxu1 }
 0x16e   :  { %v1595_v7 = vmax.f32 %v1594_v6, %v1507_v48  ;;  %v1059_v56 = vadd.f32 %v2806_v54, %v1058_v63  ;;  %v3622_v1 = vmax.f32 %v3621_v4, 0.0  ;;  %v1355_v5 = vadd.f32 %v2353_v22, %v2806_v54  ;;  %v2357_v22 = vpop.f32.mrb[70].mxu1  ;;  %v2437_v4 = vld [vmem:[%s3476_s2] ss:$0 sm:$0xff] }
 0x16f   :  { %v2097_v9 = vpack.c.bf16 %v1601_v52, %v1598_v59  ;;  %v1441_v34 = vmax.f32 %v1067_v55, 0.0  ;;  %v3624_v12 = vmax.f32 %v3623_v18, 0.0  ;;  %v1347_v13 = vadd.f32 %v2806_v54, %v1346_v30  ;;  %v1362_v63 = vpop.f32.mrb[71].mxu1 }
 0x170   :  { %v1608_v25 = vmax.f32 %v3622_v1, %v1440_v2  ;;  %v2092_v58 = vpack.c.bf16 %v1595_v7, %v1592_v21  ;;  %v1439_v50 = vmax.f32 %v1059_v56, 0.0  ;;  %v1409_v11 = vmax.f32 %v3317_v60, 0.0  ;;  %v1071_v21 = vpop.f32.mrb[69].mxu0 }
 0x171   :  { %v1602_v43 = vmax.f32 %v3624_v12, %v1438_v39  ;;  %v1407_v46 = vmax.f32 %v3387_v44, 0.0  ;;  %2131 = vst [vmem:[%s3477_s3 + $0x68] sm:$0xff] %v2097_v9   ;;  %v3626_v8 = vmax.f32 %v3625_v35, 0.0  ;;  %v3627_v48 = vmax.f32 %v3151_v40, 0.0 }
 0x172   :  { %2130 = vst [vmem:[%s3477_s3 + $0x60] sm:$0xff] %v2092_v58   ;;  %v3629_v59 = vmax.f32 %v3628_v23, 0.0  ;;  %v1605_v60 = vmax.f32 %v1403_v29, %v1439_v50  ;;  %v1513_v44 = vmax.f32 %v1355_v5, 0.0  ;;  %v1511_v33 = vmax.f32 %v1347_v13, 0.0  ;;  %v2285_v29 = vpop.f32.mrb[70].mxu0 }
 0x173   :  { %v1609_v14 = vmax.f32 %v1608_v25, %v3626_v8  ;;  %v1611_v31 = vmax.f32 %v3627_v48, %v1441_v34  ;;  %v3630_v47 = vmax.f32 %v3155_v61, 0.0  ;;  %v1080_v40 = vadd.f32 %v2284_v17, %v2806_v54  ;;  %v1074_v55 = vpop.f32.mrb[71].mxu0 }
 0x174   :  { %v1603_v36 = vmax.f32 %v1602_v43, %v3629_v59  ;;  %v1368_v37 = vadd.f32 %v2356_v15, %v2806_v54  ;;  %v3631_v27 = vmax.f32 %v3169_v62, 0.0  ;;  %v1072_v45 = vadd.f32 %v2806_v54, %v1071_v21 }
 0x175   :  { %v1610_v3 = vmax.f32 %v1609_v14, %v1512_v16  ;;  %v1612_v57 = vmax.f32 %v1611_v31, %v3630_v47  ;;  %v1360_v19 = vadd.f32 %v2806_v54, %v1359_v51  ;;  %v1444_v2 = vmax.f32 %v1080_v40, 0.0 }
 0x176   :  { %v1604_v6 = vmax.f32 %v1603_v36, %v1510_v38  ;;  %v1606_v53 = vmax.f32 %v1605_v60, %v3631_v27  ;;  %v1516_v61 = vmax.f32 %v1368_v37, 0.0  ;;  %v1083_v16 = vadd.f32 %v2285_v29, %v2806_v54 }
 0x177   :  { %v1613_v52 = vmax.f32 %v1612_v57, %v1513_v44  ;;  %v1442_v7 = vmax.f32 %v1072_v45, 0.0  ;;  %v1514_v39 = vmax.f32 %v1360_v19, 0.0  ;;  %v1075_v38 = vadd.f32 %v2806_v54, %v1074_v55 }
 0x178   :  { %v1607_v30 = vmax.f32 %v1606_v53, %v1511_v33  ;;  %v1620_v56 = vmax.f32 %v1408_v42, %v1444_v2  ;;  %v1445_v9 = vmax.f32 %v1083_v16, 0.0  ;;  %v1371_v1 = vadd.f32 %v2437_v4, %v2357_v22 }
 0x179   :  { %v2107_v62 = vpack.c.bf16 %v1613_v52, %v1610_v3  ;;  %v1614_v34 = vmax.f32 %v1406_v10, %v1442_v7  ;;  %v1443_v5 = vmax.f32 %v1075_v38, 0.0  ;;  %v1363_v58 = vadd.f32 %v2437_v4, %v1362_v63 }
 0x17a   :  { %v2102_v25 = vpack.c.bf16 %v1607_v30, %v1604_v6  ;;  %v1481_v18 = vmax.f32 %v3321_v0, 0.0  ;;  %v1621_v54 = vmax.f32 %v1620_v56, %v1480_v24  ;;  %v1623_v28 = vmax.f32 %v1409_v11, %v1445_v9 }
 0x17b   :  { %2133 = vst [vmem:[%s3477_s3 + $0x78] sm:$0xff] %v2107_v62   ;;  %v1479_v42 = vmax.f32 %v3391_v41, 0.0  ;;  %v1615_v26 = vmax.f32 %v1614_v34, %v1478_v32  ;;  %v1617_v10 = vmax.f32 %v1407_v46, %v1443_v5  ;;  %v1517_v0 = vmax.f32 %v1371_v1, 0.0 }
 0x17c   :  { %2132 = vst [vmem:[%s3477_s3 + $0x70] sm:$0xff] %v2102_v25   ;;  %v1622_v12 = vmax.f32 %v1621_v54, %v1516_v61  ;;  %v1624_v43 = vmax.f32 %v1623_v28, %v1481_v18  ;;  %v1515_v13 = vmax.f32 %v1363_v58, 0.0 }
 0x17d   :  { %v1616_v50 = vmax.f32 %v1615_v26, %v1514_v39  ;;  %v1618_v35 = vmax.f32 %v1617_v10, %v1479_v42 }
 0x17e   :  { %v1625_v8 = vmax.f32 %v1624_v43, %v1517_v0 }
 0x17f   :  { %v1619_v20 = vmax.f32 %v1618_v35, %v1515_v13 }
 0x180   :  { %v2117_v24 = vpack.c.bf16 %v1625_v8, %v1622_v12 }
 0x181   :  { %v2112_v11 = vpack.c.bf16 %v1619_v20, %v1616_v50 }
 0x182   :  { %2135 = vst [vmem:[%s3477_s3 + $0x88] sm:$0xff] %v2117_v24  }
 0x183   :  { %2134 = vst [vmem:[%s3477_s3 + $0x80] sm:$0xff] %v2112_v11  }

// kernel: cnn_fmnist_forward.3
= control target key start
LH: loop header
LB: loop body
LE: loop exit
PB: predicated region body
PF: predicated region fallthrough
CT: control target
= control target key end

     0   :  { %v2566_v1 = vmov 0   ;;  %vm603_vm0 = vcmask 130048   ;;  %s3433_s0 = inlined_call_operand.vmem [shape: bf16[4,64,400], index: 0, kind: input, shape index: {}]   ;;  %s3434_s1 = inlined_call_operand.vmem [shape: bf16[400,32], index: 1, kind: input, shape index: {}]   ;;  %s3435_s2 = inlined_call_operand.vmem [shape: f32[1,32], index: 2, kind: input, shape index: {}]   ;;  %s3436_s3 = inlined_call_operand.vmem [shape: bf16[800,128], index: 3, kind: input, shape index: {}]   ;;  %s3437_s4 = inlined_call_operand.vmem [shape: f32[1,128], index: 4, kind: input, shape index: {}]   ;;  %s3438_s5 = inlined_call_operand.vmem [shape: bf16[128,128], index: 5, kind: input, shape index: {}]   ;;  %s3439_s6 = inlined_call_operand.vmem [shape: f32[1,128], index: 6, kind: input, shape index: {}]   ;;  %s3440_s7 = inlined_call_operand.hbm [shape: f32[2,128], index: 7, kind: output, shape index: {}]  }
   0x1   :  { %v2363_v0 = vld [vmem:[%s3434_s1 + $0x40] sm:$0xff]   ;;  %813 = vmatprep.subr.bf16.mxu1 %v2566_v1  ;;  %v2366_v4 = vld [vmem:[%s3434_s1 + $0x48] sm:$0xff]   ;;  %v2369_v7 = vld [vmem:[%s3434_s1 + $0x50] sm:$0xff]  }
   0x2   :  { %v2364_v2 = vld [vmem:[%s3434_s1 + $0x80] sm:$0xff]   ;;  %2093 = vmatprep.subr.bf16.mxu0 %v2363_v0  ;;  %v2367_v5 = vld [vmem:[%s3434_s1 + $0x88] sm:$0xff]   ;;  %v2370_v8 = vld [vmem:[%s3434_s1 + $0x90] sm:$0xff]  }
   0x3   :  { %v2365_v3 = vld [vmem:[%s3434_s1] sm:$0xff]   ;;  %814 = vmatpush1.bf16.msra.mxu1 %v2364_v2  ;;  %v2368_v6 = vld [vmem:[%s3434_s1 + $0x8] sm:$0xff]   ;;  %v2371_v9 = vld [vmem:[%s3434_s1 + $0x10] sm:$0xff]  }
   0x4   :  { %2094 = vmatpush3.bf16.msra.mxu0 %v2365_v3  ;;  %815 = vmatprep.subr.bf16.mxu1 %v2566_v1  ;;  %v2372_v10 = vld [vmem:[%s3434_s1 + $0x58] sm:$0xff]   ;;  %v2375_v13 = vld [vmem:[%s3434_s1 + $0x60] sm:$0xff]   ;;  %v2378_v16 = vld [vmem:[%s3434_s1 + $0x68] sm:$0xff]  }
   0x5   :  { %2095 = vmatprep.subr.bf16.mxu0 %v2366_v4  ;;  %v2373_v11 = vld [vmem:[%s3434_s1 + $0x98] sm:$0xff]   ;;  %v2376_v14 = vld [vmem:[%s3434_s1 + $0xa0] sm:$0xff]   ;;  %v2379_v17 = vld [vmem:[%s3434_s1 + $0xa8] sm:$0xff]  }
   0x6   :  { %v2374_v12 = vld [vmem:[%s3434_s1 + $0x18] sm:$0xff]   ;;  %v2377_v15 = vld [vmem:[%s3434_s1 + $0x20] sm:$0xff]   ;;  %v2380_v18 = vld [vmem:[%s3434_s1 + $0x28] sm:$0xff]  }
   0x7   :  { %816 = vmatpush1.bf16.msra.mxu1 %v2367_v5  ;;  %v2381_v19 = vld [vmem:[%s3434_s1 + $0x70] sm:$0xff]   ;;  %v2384_v22 = vld [vmem:[%s3434_s1 + $0x78] sm:$0xff]   ;;  %v2390_v28 = vld [vmem:[%s3434_s1 + $0xc0] sm:$0xff]  }
   0x8   :  { %2096 = vmatpush3.bf16.msra.mxu0 %v2368_v6  ;;  %817 = vmatprep.subr.bf16.mxu1 %v2566_v1  ;;  %v2382_v20 = vld [vmem:[%s3434_s1 + $0xb0] sm:$0xff]   ;;  %v2385_v24 = vld [vmem:[%s3434_s1 + $0xb8] sm:$0xff]  }
   0x9   :  { %2097 = vmatprep.subr.bf16.mxu0 %v2369_v7  ;;  %v2383_v21 = vld [vmem:[%s3434_s1 + $0x30] sm:$0xff]   ;;  %v2393_v25 = vld [vmem:[%s3433_s0 + $0xc] ss:$16 sps:$4 sm:$0xff]   ;;  %v2391_v30 = vld [vmem:[%s3433_s0 + $0x8] ss:$16 sps:$4 sm:$0xff]  }
   0xa   :  { %v2389_v23 = vld [vmem:[%s3433_s0 + $0x4] ss:$16 sps:$4 sm:$0xff]   ;;  %v2386_v26 = vld [vmem:[%s3434_s1 + $0x38] sm:$0xff]   ;;  %2016 = vmatprep.mubr.msk.bf16.mxu1 %vm603_vm0, %v2393_v25  ;;  %v2387_v27 = vld [vmem:[%s3433_s0] ss:$16 sps:$4 sm:$0xff]  }
   0xb   :  { %818 = vmatpush1.bf16.msra.mxu1 %v2370_v8  ;;  %684 = vmatprep.mubr.bf16.mxu0 %v2389_v23  ;;  %v2394_v29 = vld [vmem:[%s3433_s0 + $0x24] ss:$16 sps:$4 sm:$0xff]   ;;  %v2397_v31 = vld [vmem:[%s3433_s0 + $0x2c] ss:$16 sps:$4 sm:$0xff]   ;;  %v2396_v32 = vld [vmem:[%s3433_s0 + $0x20] ss:$16 sps:$4 sm:$0xff]  }
   0xc   :  { %2098 = vmatpush3.bf16.msra.mxu0 %v2371_v9  ;;  %819 = vmatprep.subr.bf16.mxu1 %v2566_v1  ;;  %v2400_v33 = vld [vmem:[%s3433_s0 + $0x44] ss:$16 sps:$4 sm:$0xff]   ;;  %v2399_v34 = vld [vmem:[%s3433_s0 + $0x28] ss:$16 sps:$4 sm:$0xff]   ;;  %v2403_v35 = vld [vmem:[%s3433_s0 + $0x4c] ss:$16 sps:$4 sm:$0xff]  }
   0xd   :  { %2099 = vmatprep.subr.bf16.mxu0 %v2372_v10  ;;  %v2402_v36 = vld [vmem:[%s3433_s0 + $0x40] ss:$16 sps:$4 sm:$0xff]   ;;  %v2406_v37 = vld [vmem:[%s3433_s0 + $0x64] ss:$16 sps:$4 sm:$0xff]   ;;  %v2405_v38 = vld [vmem:[%s3433_s0 + $0x48] ss:$16 sps:$4 sm:$0xff]  }
   0xe   :  { %v2409_v39 = vld [vmem:[%s3433_s0 + $0x6c] ss:$16 sps:$4 sm:$0xff]   ;;  %v2408_v40 = vld [vmem:[%s3433_s0 + $0x60] ss:$16 sps:$4 sm:$0xff]   ;;  %v2412_v41 = vld [vmem:[%s3433_s0 + $0x84] ss:$16 sps:$4 sm:$0xff]  }
   0xf   :  { %820 = vmatpush1.bf16.msra.mxu1 %v2373_v11  ;;  %v2411_v42 = vld [vmem:[%s3433_s0 + $0x68] ss:$16 sps:$4 sm:$0xff]   ;;  %v2415_v43 = vld [vmem:[%s3433_s0 + $0x8c] ss:$16 sps:$4 sm:$0xff]   ;;  %v2414_v44 = vld [vmem:[%s3433_s0 + $0x80] ss:$16 sps:$4 sm:$0xff]  }
  0x10   :  { %2100 = vmatpush3.bf16.msra.mxu0 %v2374_v12  ;;  %821 = vmatprep.subr.bf16.mxu1 %v2566_v1  ;;  %v2418_v45 = vld [vmem:[%s3433_s0 + $0xa4] ss:$16 sps:$4 sm:$0xff]   ;;  %v2417_v46 = vld [vmem:[%s3433_s0 + $0x88] ss:$16 sps:$4 sm:$0xff]   ;;  %v2421_v47 = vld [vmem:[%s3433_s0 + $0xac] ss:$16 sps:$4 sm:$0xff]  }
  0x11   :  { %2101 = vmatprep.subr.bf16.mxu0 %v2375_v13  ;;  %v2420_v48 = vld [vmem:[%s3433_s0 + $0xa0] ss:$16 sps:$4 sm:$0xff]   ;;  %v2424_v49 = vld [vmem:[%s3433_s0 + $0xc4] ss:$16 sps:$4 sm:$0xff]   ;;  %v2423_v50 = vld [vmem:[%s3433_s0 + $0xa8] ss:$16 sps:$4 sm:$0xff]  }
  0x12   :  { %v2427_v51 = vld [vmem:[%s3433_s0 + $0xcc] ss:$16 sps:$4 sm:$0xff]   ;;  %v2426_v52 = vld [vmem:[%s3433_s0 + $0xc0] ss:$16 sps:$4 sm:$0xff]   ;;  %v2430_v53 = vld [vmem:[%s3433_s0 + $0xe4] ss:$16 sps:$4 sm:$0xff]  }
  0x13   :  { %822 = vmatpush1.bf16.msra.mxu1 %v2376_v14  ;;  %v2429_v54 = vld [vmem:[%s3433_s0 + $0xc8] ss:$16 sps:$4 sm:$0xff]   ;;  %v2433_v55 = vld [vmem:[%s3433_s0 + $0xec] ss:$16 sps:$4 sm:$0xff]   ;;  %v2432_v56 = vld [vmem:[%s3433_s0 + $0xe0] ss:$16 sps:$4 sm:$0xff]  }
  0x14   :  { %2102 = vmatpush3.bf16.msra.mxu0 %v2377_v15  ;;  %823 = vmatprep.subr.bf16.mxu1 %v2566_v1  ;;  %v2436_v57 = vld [vmem:[%s3433_s0 + $0x104] ss:$16 sps:$4 sm:$0xff]   ;;  %v2435_v58 = vld [vmem:[%s3433_s0 + $0xe8] ss:$16 sps:$4 sm:$0xff]   ;;  %v2439_v59 = vld [vmem:[%s3433_s0 + $0x10c] ss:$16 sps:$4 sm:$0xff]  }
  0x15   :  { %2103 = vmatprep.subr.bf16.mxu0 %v2378_v16  ;;  %v2438_v60 = vld [vmem:[%s3433_s0 + $0x100] ss:$16 sps:$4 sm:$0xff]   ;;  %v2442_v61 = vld [vmem:[%s3433_s0 + $0x124] ss:$16 sps:$4 sm:$0xff]   ;;  %v2441_v62 = vld [vmem:[%s3433_s0 + $0x108] ss:$16 sps:$4 sm:$0xff]  }
  0x16   :  { %v2445_v63 = vld [vmem:[%s3433_s0 + $0x12c] ss:$16 sps:$4 sm:$0xff]   ;;  %v2444_v0 = vld [vmem:[%s3433_s0 + $0x120] ss:$16 sps:$4 sm:$0xff]   ;;  %v2447_v2 = vld [vmem:[%s3433_s0 + $0x128] ss:$16 sps:$4 sm:$0xff]  }
  0x17   :  { %824 = vmatpush1.bf16.msra.mxu1 %v2379_v17 }
  0x18   :  { %2104 = vmatpush3.bf16.msra.mxu0 %v2380_v18  ;;  %825 = vmatprep.subr.bf16.mxu1 %v2566_v1 }
  0x19   :  { %2105 = vmatprep.subr.bf16.mxu0 %v2381_v19 }
  0x1b   :  { %826 = vmatpush1.bf16.msra.mxu1 %v2382_v20 }
  0x1c   :  { %2106 = vmatpush3.bf16.msra.mxu0 %v2383_v21  ;;  %827 = vmatprep.subr.bf16.mxu1 %v2566_v1 }
  0x1d   :  { %2107 = vmatprep.subr.bf16.mxu0 %v2384_v22 }
  0x1f   :  { %828 = vmatpush1.bf16.msra.mxu1 %v2385_v24 }
  0x20   :  { %2108 = vmatpush3.bf16.msra.mxu0 %v2386_v26  ;;  %829 = vmatprep.subr.bf16.mxu1 %v2566_v1  ;;  %v2448_v1 = vld [vmem:[%s3433_s0 + $0x144] ss:$16 sps:$4 sm:$0xff]  }
  0x23   :  { %685 = vmatmul.mubr.bf16.vlgmr.msra.gmra.mrb[0].mxu0 %v2387_v27  ;;  %830 = vmatpush1.bf16.msra.mxu1 %v2390_v28 }
  0x24   :  { %692 = vmatprep.mubr.bf16.mxu0 %v2394_v29 }
  0x26   :  { %846 = vmatmul.mubr.bf16.vlgmr.msra.gmra.mrb[0].mxu1 %v2391_v30 }
  0x27   :  { %2017 = vmatprep.mubr.msk.bf16.mxu1 %vm603_vm0, %v2397_v31 }
  0x2b   :  { %693 = vmatmul.mubr.bf16.gmra.mrb[4].mxu0 %v2396_v32 }
  0x2c   :  { %700 = vmatprep.mubr.bf16.mxu0 %v2400_v33 }
  0x2e   :  { %854 = vmatmul.mubr.bf16.gmra.mrb[4].mxu1 %v2399_v34 }
  0x2f   :  { %2018 = vmatprep.mubr.msk.bf16.mxu1 %vm603_vm0, %v2403_v35 }
  0x33   :  { %701 = vmatmul.mubr.bf16.gmra.mrb[8].mxu0 %v2402_v36 }
  0x34   :  { %708 = vmatprep.mubr.bf16.mxu0 %v2406_v37 }
  0x36   :  { %862 = vmatmul.mubr.bf16.gmra.mrb[8].mxu1 %v2405_v38 }
  0x37   :  { %2019 = vmatprep.mubr.msk.bf16.mxu1 %vm603_vm0, %v2409_v39 }
  0x3b   :  { %709 = vmatmul.mubr.bf16.gmra.mrb[12].mxu0 %v2408_v40 }
  0x3c   :  { %716 = vmatprep.mubr.bf16.mxu0 %v2412_v41 }
  0x3e   :  { %870 = vmatmul.mubr.bf16.gmra.mrb[12].mxu1 %v2411_v42 }
  0x3f   :  { %2020 = vmatprep.mubr.msk.bf16.mxu1 %vm603_vm0, %v2415_v43 }
  0x43   :  { %717 = vmatmul.mubr.bf16.gmra.mrb[16].mxu0 %v2414_v44 }
  0x44   :  { %724 = vmatprep.mubr.bf16.mxu0 %v2418_v45 }
  0x46   :  { %878 = vmatmul.mubr.bf16.gmra.mrb[16].mxu1 %v2417_v46 }
  0x47   :  { %2021 = vmatprep.mubr.msk.bf16.mxu1 %vm603_vm0, %v2421_v47 }
  0x4b   :  { %725 = vmatmul.mubr.bf16.gmra.mrb[20].mxu0 %v2420_v48 }
  0x4c   :  { %732 = vmatprep.mubr.bf16.mxu0 %v2424_v49 }
  0x4e   :  { %886 = vmatmul.mubr.bf16.gmra.mrb[20].mxu1 %v2423_v50 }
  0x4f   :  { %2022 = vmatprep.mubr.msk.bf16.mxu1 %vm603_vm0, %v2427_v51 }
  0x53   :  { %733 = vmatmul.mubr.bf16.gmra.mrb[24].mxu0 %v2426_v52 }
  0x54   :  { %740 = vmatprep.mubr.bf16.mxu0 %v2430_v53 }
  0x56   :  { %894 = vmatmul.mubr.bf16.gmra.mrb[24].mxu1 %v2429_v54 }
  0x57   :  { %2023 = vmatprep.mubr.msk.bf16.mxu1 %vm603_vm0, %v2433_v55 }
  0x5b   :  { %741 = vmatmul.mubr.bf16.gmra.mrb[28].mxu0 %v2432_v56 }
  0x5c   :  { %748 = vmatprep.mubr.bf16.mxu0 %v2436_v57 }
  0x5e   :  { %902 = vmatmul.mubr.bf16.gmra.mrb[28].mxu1 %v2435_v58 }
  0x5f   :  { %2024 = vmatprep.mubr.msk.bf16.mxu1 %vm603_vm0, %v2439_v59 }
  0x63   :  { %749 = vmatmul.mubr.bf16.gmra.mrb[32].mxu0 %v2438_v60 }
  0x64   :  { %756 = vmatprep.mubr.bf16.mxu0 %v2442_v61 }
  0x66   :  { %910 = vmatmul.mubr.bf16.gmra.mrb[32].mxu1 %v2441_v62 }
  0x67   :  { %2025 = vmatprep.mubr.msk.bf16.mxu1 %vm603_vm0, %v2445_v63 }
  0x68   :  { %12 = vsyncpa [#allocation3], 0  ;;  %v2451_v3 = vld [vmem:[%s3433_s0 + $0x14c] ss:$16 sps:$4 sm:$0xff]   ;;  %v2450_v4 = vld [vmem:[%s3433_s0 + $0x140] ss:$16 sps:$4 sm:$0xff]  }
  0x69   :  { %v2454_v5 = vld [vmem:[%s3433_s0 + $0x164] ss:$16 sps:$4 sm:$0xff]   ;;  %v2453_v6 = vld [vmem:[%s3433_s0 + $0x148] ss:$16 sps:$4 sm:$0xff]   ;;  %v2457_v7 = vld [vmem:[%s3433_s0 + $0x16c] ss:$16 sps:$4 sm:$0xff]  }
  0x6a   :  { %v2456_v8 = vld [vmem:[%s3433_s0 + $0x160] ss:$16 sps:$4 sm:$0xff]   ;;  %v2460_v9 = vld [vmem:[%s3433_s0 + $0x184] ss:$16 sps:$4 sm:$0xff]   ;;  %v2459_v10 = vld [vmem:[%s3433_s0 + $0x168] ss:$16 sps:$4 sm:$0xff]  }
  0x6b   :  { %757 = vmatmul.mubr.bf16.gmra.mrb[36].mxu0 %v2444_v0  ;;  %v2463_v11 = vld [vmem:[%s3433_s0 + $0x18c] ss:$16 sps:$4 sm:$0xff]   ;;  %v2462_v12 = vld [vmem:[%s3433_s0 + $0x180] ss:$16 sps:$4 sm:$0xff]   ;;  %v2466_v13 = vld [vmem:[%s3433_s0 + $0x1a4] ss:$16 sps:$4 sm:$0xff]  }
  0x6c   :  { %764 = vmatprep.mubr.bf16.mxu0 %v2448_v1  ;;  %v2465_v14 = vld [vmem:[%s3433_s0 + $0x188] ss:$16 sps:$4 sm:$0xff]   ;;  %v2469_v15 = vld [vmem:[%s3433_s0 + $0x1ac] ss:$16 sps:$4 sm:$0xff]   ;;  %v2468_v16 = vld [vmem:[%s3433_s0 + $0x1a0] ss:$16 sps:$4 sm:$0xff]  }
  0x6d   :  { %v2472_v17 = vld [vmem:[%s3433_s0 + $0x1c4] ss:$16 sps:$4 sm:$0xff]   ;;  %v2471_v18 = vld [vmem:[%s3433_s0 + $0x1a8] ss:$16 sps:$4 sm:$0xff]   ;;  %v2475_v19 = vld [vmem:[%s3433_s0 + $0x1cc] ss:$16 sps:$4 sm:$0xff]  }
  0x6e   :  { %918 = vmatmul.mubr.bf16.gmra.mrb[36].mxu1 %v2447_v2  ;;  %v2474_v20 = vld [vmem:[%s3433_s0 + $0x1c0] ss:$16 sps:$4 sm:$0xff]   ;;  %v2478_v21 = vld [vmem:[%s3433_s0 + $0x1e4] ss:$16 sps:$4 sm:$0xff]   ;;  %v2477_v22 = vld [vmem:[%s3433_s0 + $0x1c8] ss:$16 sps:$4 sm:$0xff]  }
  0x6f   :  { %2026 = vmatprep.mubr.msk.bf16.mxu1 %vm603_vm0, %v2451_v3  ;;  %v2481_v23 = vld [vmem:[%s3433_s0 + $0x1ec] ss:$16 sps:$4 sm:$0xff]   ;;  %v2480_v24 = vld [vmem:[%s3433_s0 + $0x1e0] ss:$16 sps:$4 sm:$0xff]   ;;  %v2483_v25 = vld [vmem:[%s3433_s0 + $0x1e8] ss:$16 sps:$4 sm:$0xff]  }
  0x70   :  { %v2899_v28 = vld [vmem:[%s3435_s2] ss:$0 sm:$0xff]  ;;  %v2486_v56 = vld [vmem:[%s3436_s3 + $0x48] sm:$0xff]   ;;  %v2488_v1 = vld [vmem:[%s3436_s3 + $0x50] sm:$0xff]   ;;  %vm1006_vm1 = vcmask 261120   ;;  %vm1066_vm2 = vcmask 1041409  }
  0x71   :  { %v2484_v45 = vld [vmem:[%s3436_s3 + $0x40] sm:$0xff]   ;;  %v2487_v57 = vld [vmem:[%s3436_s3 + $0x8] sm:$0xff]   ;;  %v2490_v3 = vld [vmem:[%s3436_s3 + $0x10] sm:$0xff]   ;;  %s2567_s20 = smov 96   ;;  %s2568_s21 = smov 32   ;;  %vm1153_vm3 = vcmask 523264  }
  0x72   :  { %v2485_v46 = vld [vmem:[%s3436_s3] sm:$0xff]   ;;  %2205 = vmatprep.subr.bf16.mxu0 %v2484_v45  ;;  %s2569_s24 = smov 64   ;;  %vm1155_vm4 = vcmask 785408   ;;  %vm2571_vm5 = vmmov 0   ;;  %s2572_s28 = smov [#allocation2]  }
  0x73   :  { %765 = vmatmul.mubr.bf16.gmra.mrb[40].mxu0 %v2450_v4  ;;  %v2489_v2 = vld [vmem:[%s3436_s3 + $0xc0] sm:$0xff]   ;;  %s1918_s29 = sshll.u32 %s2572_s28, 4  ;;  %s1919_s29 = int_to_ptr.vmem [resolvable:$true] %s1918_s29 }
  0x74   :  { %772 = vmatprep.mubr.bf16.mxu0 %v2454_v5  ;;  %2206 = vmatpush3.bf16.msra.mxu0 %v2485_v46  ;;  %s2542_s30 = scalar_lea.vmem %s1919_s29, 32  ;;  %p2547_p1 = scmp.lt.s32.totalorder %s1919_s29, %s1919_s29 }
  0x75   :  { %2207 = vmatprep.subr.bf16.mxu0 %v2486_v56  ;;  %2227 = vmatprep.subr.bf16.mxu1 %v2489_v2  ;;  %p2543_p0 = scmp.ne.s32.totalorder %s1919_s29, %s2542_s30  ;;  %p2548_p2 = scmp.lt.s32.totalorder %s2542_s30, %s2542_s30 }
  0x76   :  { %926 = vmatmul.mubr.bf16.gmra.mrb[40].mxu1 %v2453_v6 }
  0x77   :  { %2027 = vmatprep.mubr.msk.bf16.mxu1 %vm603_vm0, %v2457_v7  ;;  %v2491_v7 = vld [vmem:[%s3436_s3 + $0x80] sm:$0xff]   ;;  %p2549_p3 = por %p2548_p2, %p2547_p1 }
  0x78   :  { %2208 = vmatpush3.bf16.msra.mxu0 %v2487_v57  ;;  %2228 = vmatpush3.bf16.msra.mxu1 %v2491_v7 }
  0x79   :  { %2209 = vmatprep.subr.bf16.mxu0 %v2488_v1  ;;  %v2511_v1 = vld [vmem:[%s3436_s3 + $0xa8] sm:$0xff]   ;;  %p2550_p4 = pnand %p2549_p3, %p2543_p0 }
  0x7b   :  { %773 = vmatmul.mubr.bf16.gmra.mrb[44].mxu0 %v2456_v8  ;;  %v2492_v8 = vld [vmem:[%s3436_s3 + $0x58] sm:$0xff]  }
  0x7c   :  { %780 = vmatprep.mubr.bf16.mxu0 %v2460_v9  ;;  %v2493_v9 = vld [vmem:[%s3436_s3 + $0xc8] sm:$0xff]   ;;  %2210 = vmatpush3.bf16.msra.mxu0 %v2490_v3 }
  0x7d   :  { %2211 = vmatprep.subr.bf16.mxu0 %v2492_v8  ;;  %2229 = vmatprep.subr.bf16.mxu1 %v2493_v9 }
  0x7e   :  { %934 = vmatmul.mubr.bf16.gmra.mrb[44].mxu1 %v2459_v10 }
  0x7f   :  { %2028 = vmatprep.mubr.msk.bf16.mxu1 %vm603_vm0, %v2463_v11 }
  0x83   :  { %781 = vmatmul.mubr.bf16.gmra.mrb[48].mxu0 %v2462_v12 }
  0x84   :  { %788 = vmatprep.mubr.bf16.mxu0 %v2466_v13 }
  0x86   :  { %942 = vmatmul.mubr.bf16.gmra.mrb[48].mxu1 %v2465_v14  ;;  %v2494_v14 = vld [vmem:[%s3436_s3 + $0x18] sm:$0xff]  }
  0x87   :  { %2029 = vmatprep.mubr.msk.bf16.mxu1 %vm603_vm0, %v2469_v15  ;;  %v2495_v15 = vld [vmem:[%s3436_s3 + $0x88] sm:$0xff]   ;;  %2212 = vmatpush3.bf16.msra.mxu0 %v2494_v14 }
  0x88   :  { %2230 = vmatpush3.bf16.msra.mxu1 %v2495_v15 }
  0x8b   :  { %789 = vmatmul.mubr.bf16.gmra.mrb[52].mxu0 %v2468_v16  ;;  %v2496_v16 = vld [vmem:[%s3436_s3 + $0x60] sm:$0xff]  }
  0x8c   :  { %796 = vmatprep.mubr.bf16.mxu0 %v2472_v17  ;;  %v2497_v17 = vld [vmem:[%s3436_s3 + $0xd0] sm:$0xff]   ;;  %2213 = vmatprep.subr.bf16.mxu0 %v2496_v16 }
  0x8d   :  { %2231 = vmatprep.subr.bf16.mxu1 %v2497_v17 }
  0x8e   :  { %950 = vmatmul.mubr.bf16.gmra.mrb[52].mxu1 %v2471_v18 }
  0x8f   :  { %2030 = vmatprep.mubr.msk.bf16.mxu1 %vm603_vm0, %v2475_v19 }
  0x93   :  { %797 = vmatmul.mubr.bf16.gmra.mrb[56].mxu0 %v2474_v20 }
  0x94   :  { %804 = vmatprep.mubr.bf16.mxu0 %v2478_v21 }
  0x96   :  { %958 = vmatmul.mubr.bf16.gmra.mrb[56].mxu1 %v2477_v22 }
  0x97   :  { %2031 = vmatprep.mubr.msk.bf16.mxu1 %vm603_vm0, %v2481_v23  ;;  %v2498_v23 = vld [vmem:[%s3436_s3 + $0x20] sm:$0xff]  }
  0x98   :  { %2214 = vmatpush3.bf16.msra.mxu0 %v2498_v23 }
  0x9b   :  { %805 = vmatmul.mubr.bf16.gmra.mrb[60].mxu0 %v2480_v24  ;;  %v2499_v24 = vld [vmem:[%s3436_s3 + $0x90] sm:$0xff]  }
  0x9c   :  { %2232 = vmatpush3.bf16.msra.mxu1 %v2499_v24 }
  0x9e   :  { %966 = vmatmul.mubr.bf16.gmra.mrb[60].mxu1 %v2483_v25 }
  0xf6   :  { %v2109_v26 = vpop.f32.mrb[0].mxu0 }
  0xf7   :  { %v2110_v27 = vpop.f32.mrb[1].mxu0 }
  0xf8   :  { %v2111_v29 = vadd.f32 %v2110_v27, %v2109_v26  ;;  %v2112_v30 = vpop.f32.mrb[2].mxu0  ;;  %v2500_v27 = vld [vmem:[%s3436_s3 + $0x68] sm:$0xff]  }
  0xf9   :  { %v2113_v31 = vpop.f32.mrb[3].mxu0  ;;  %v847_v32 = vpop.f32.mrb[0].mxu1  ;;  %2215 = vmatprep.subr.bf16.mxu0 %v2500_v27 }
  0xfa   :  { %v2114_v33 = vadd.f32 %v2113_v31, %v2112_v30  ;;  %v687_v34 = vadd.f32 %v2111_v29, %v2899_v28  ;;  %v849_v35 = vpop.f32.mrb[1].mxu1  ;;  %v2501_v29 = vld [vmem:[%s3436_s3 + $0xd8] sm:$0xff]  }
  0xfb   :  { %v850_v36 = vpop.f32.mrb[2].mxu1  ;;  %2233 = vmatprep.subr.bf16.mxu1 %v2501_v29 }
  0xfc   :  { %v2902_v37 = vadd.f32 %v847_v32, %v687_v34  ;;  %v690_v38 = vadd.f32 %v2114_v33, %v2899_v28  ;;  %v852_v39 = vpop.f32.mrb[3].mxu1 }
  0xfd   :  { %v2503_v39 = vld [vmem:[%s3436_s3 + $0x98] sm:$0xff]  }
  0xfe   :  { %v2905_v40 = vadd.f32 %v850_v36, %v690_v38  ;;  %v2115_v41 = vpop.f32.mrb[4].mxu0  ;;  %v2502_v38 = vld [vmem:[%s3436_s3 + $0x28] sm:$0xff]   ;;  %2234 = vmatpush3.bf16.msra.mxu1 %v2503_v39 }
  0xff   :  { %v2116_v42 = vpop.f32.mrb[5].mxu0  ;;  %2216 = vmatpush3.bf16.msra.mxu0 %v2502_v38 }
 0x100   :  { %v2117_v43 = vadd.f32 %v2116_v42, %v2115_v41  ;;  %v2118_v44 = vpop.f32.mrb[6].mxu0  ;;  %v2504_v41 = vld [vmem:[%s3436_s3 + $0x70] sm:$0xff]   ;;  %v2505_v42 = vld [vmem:[%s3436_s3 + $0xe0] sm:$0xff]   ;;  %v975_v2 = vmax.f32 %v2905_v40, 0.0 }
 0x101   :  { %v2119_v47 = vpop.f32.mrb[7].mxu0  ;;  %v855_v48 = vpop.f32.mrb[4].mxu1  ;;  %2217 = vmatprep.subr.bf16.mxu0 %v2504_v41  ;;  %2235 = vmatprep.subr.bf16.mxu1 %v2505_v42 }
 0x102   :  { %v2120_v49 = vadd.f32 %v2119_v47, %v2118_v44  ;;  %v695_v50 = vadd.f32 %v2117_v43, %v2899_v28  ;;  %v857_v51 = vpop.f32.mrb[5].mxu1  ;;  %v3022_v14 = vsel %vm1006_vm1, %v975_v2, -inf }
 0x103   :  { %v858_v52 = vpop.f32.mrb[6].mxu1 }
 0x104   :  { %v2914_v53 = vadd.f32 %v855_v48, %v695_v50  ;;  %v698_v54 = vadd.f32 %v2120_v49, %v2899_v28  ;;  %v860_v55 = vpop.f32.mrb[7].mxu1  ;;  %v2506_v48 = vld [vmem:[%s3436_s3 + $0x30] sm:$0xff]   ;;  %v2507_v49 = vld [vmem:[%s3436_s3 + $0xa0] sm:$0xff]  }
 0x105   :  { %2218 = vmatpush3.bf16.msra.mxu0 %v2506_v48  ;;  %2236 = vmatpush3.bf16.msra.mxu1 %v2507_v49 }
 0x106   :  { %v2923_v58 = vadd.f32 %v858_v52, %v698_v54  ;;  %v2121_v59 = vpop.f32.mrb[8].mxu0  ;;  %v2508_v52 = vld [vmem:[%s3436_s3 + $0x78] sm:$0xff]   ;;  %v2509_v54 = vld [vmem:[%s3436_s3 + $0xe8] sm:$0xff]  }
 0x107   :  { %v2122_v60 = vpop.f32.mrb[9].mxu0  ;;  %2219 = vmatprep.subr.bf16.mxu0 %v2508_v52  ;;  %2237 = vmatprep.subr.bf16.mxu1 %v2509_v54 }
 0x108   :  { %v2123_v61 = vadd.f32 %v2122_v60, %v2121_v59  ;;  %v2124_v62 = vpop.f32.mrb[10].mxu0  ;;  %v974_v60 = vmax.f32 %v2902_v37, 0.0 }
 0x109   :  { %v2125_v63 = vpop.f32.mrb[11].mxu0  ;;  %v863_v0 = vpop.f32.mrb[8].mxu1  ;;  %2238 = vmatpush3.bf16.msra.mxu1 %v2511_v1 }
 0x10a   :  { %v2126_v4 = vadd.f32 %v2125_v63, %v2124_v62  ;;  %v703_v5 = vadd.f32 %v2123_v61, %v2899_v28  ;;  %v865_v6 = vpop.f32.mrb[9].mxu1 }
 0x10b   :  { %v866_v10 = vpop.f32.mrb[10].mxu1  ;;  %v3014_v6 = vsel %vm1006_vm1, %v974_v60, -inf }
 0x10c   :  { %v2944_v11 = vadd.f32 %v863_v0, %v703_v5  ;;  %v706_v12 = vadd.f32 %v2126_v4, %v2899_v28  ;;  %v868_v13 = vpop.f32.mrb[11].mxu1  ;;  %v2510_v0 = vld [vmem:[%s3436_s3 + $0x38] sm:$0xff]  }
 0x10d   :  { %2220 = vmatpush3.bf16.msra.mxu0 %v2510_v0 }
 0x10e   :  { %v2959_v18 = vadd.f32 %v866_v10, %v706_v12  ;;  %v2127_v19 = vpop.f32.mrb[12].mxu0  ;;  %v978_v49 = vmax.f32 %v2944_v11, 0.0 }
 0x10f   :  { %v2128_v20 = vpop.f32.mrb[13].mxu0 }
 0x110   :  { %v2129_v21 = vadd.f32 %v2128_v20, %v2127_v19  ;;  %v2130_v22 = vpop.f32.mrb[14].mxu0  ;;  %v979_v54 = vmax.f32 %v2959_v18, 0.0  ;;  %v3054_v60 = vsel %vm1006_vm1, %v978_v49, -inf }
 0x111   :  { %v2131_v25 = vpop.f32.mrb[15].mxu0  ;;  %v871_v26 = vpop.f32.mrb[12].mxu1 }
 0x112   :  { %v2132_v30 = vadd.f32 %v2131_v25, %v2130_v22  ;;  %v711_v31 = vadd.f32 %v2129_v21, %v2899_v28  ;;  %v873_v32 = vpop.f32.mrb[13].mxu1  ;;  %v976_v22 = vmax.f32 %v2914_v53, 0.0  ;;  %v3062_v18 = vsel %vm1006_vm1, %v979_v54, -inf }
 0x113   :  { %v874_v33 = vpop.f32.mrb[14].mxu1 }
 0x114   :  { %v2974_v34 = vadd.f32 %v871_v26, %v711_v31  ;;  %v714_v35 = vadd.f32 %v2132_v30, %v2899_v28  ;;  %v876_v36 = vpop.f32.mrb[15].mxu1  ;;  %v977_v26 = vmax.f32 %v2923_v58, 0.0  ;;  %v3034_v32 = vsel %vm1006_vm1, %v976_v22, -inf }
 0x116   :  { %v2989_v43 = vadd.f32 %v874_v33, %v714_v35  ;;  %v2133_v44 = vpop.f32.mrb[16].mxu0  ;;  %v3042_v58 = vsel %vm1006_vm1, %v977_v26, -inf }
 0x117   :  { %v2134_v45 = vpop.f32.mrb[17].mxu0 }
 0x118   :  { %v2135_v46 = vadd.f32 %v2134_v45, %v2133_v44  ;;  %v2136_v47 = vpop.f32.mrb[18].mxu0 }
 0x119   :  { %v2137_v50 = vpop.f32.mrb[19].mxu0  ;;  %v879_v51 = vpop.f32.mrb[16].mxu1 }
 0x11a   :  { %v2138_v55 = vadd.f32 %v2137_v50, %v2136_v47  ;;  %v719_v56 = vadd.f32 %v2135_v46, %v2899_v28  ;;  %v881_v57 = vpop.f32.mrb[17].mxu1 }
 0x11b   :  { %v882_v59 = vpop.f32.mrb[18].mxu1 }
 0x11c   :  { %v880_v61 = vadd.f32 %v879_v51, %v719_v56  ;;  %v722_v62 = vadd.f32 %v2138_v55, %v2899_v28  ;;  %v884_v63 = vpop.f32.mrb[19].mxu1 }
 0x11e   :  { %v982_v37 = vmax.f32 %v880_v61, 0.0  ;;  %v883_v3 = vadd.f32 %v882_v59, %v722_v62  ;;  %v2139_v4 = vpop.f32.mrb[20].mxu0 }
 0x11f   :  { %v2140_v5 = vpop.f32.mrb[21].mxu0 }
 0x120   :  { %v3017_v7 = vsel %vm1006_vm1, %v982_v37, -inf  ;;  %v983_v8 = vmax.f32 %v883_v3, 0.0  ;;  %v2141_v9 = vadd.f32 %v2140_v5, %v2139_v4  ;;  %v2142_v10 = vpop.f32.mrb[22].mxu0 }
 0x121   :  { %v1009_v12 = vmax.f32 %v3014_v6, %v3017_v7  ;;  %v2143_v13 = vpop.f32.mrb[23].mxu0  ;;  %v887_v40 = vpop.f32.mrb[20].mxu1 }
 0x122   :  { %v3025_v15 = vsel %vm1006_vm1, %v983_v8, -inf  ;;  %v2144_v16 = vadd.f32 %v2143_v13, %v2142_v10  ;;  %v727_v17 = vadd.f32 %v2141_v9, %v2899_v28  ;;  %v889_v19 = vpop.f32.mrb[21].mxu1  ;;  %v980_v10 = vmax.f32 %v2974_v34, 0.0 }
 0x123   :  { %v1016_v20 = vmax.f32 %v3022_v14, %v3025_v15  ;;  %v890_v21 = vpop.f32.mrb[22].mxu1 }
 0x124   :  { %v888_v23 = vadd.f32 %v887_v40, %v727_v17  ;;  %v730_v24 = vadd.f32 %v2144_v16, %v2899_v28  ;;  %v892_v25 = vpop.f32.mrb[23].mxu1  ;;  %v981_v17 = vmax.f32 %v2989_v43, 0.0 }
 0x126   :  { %v984_v27 = vmax.f32 %v888_v23, 0.0  ;;  %v891_v29 = vadd.f32 %v890_v21, %v730_v24  ;;  %v2145_v30 = vpop.f32.mrb[24].mxu0  ;;  %v3074_v24 = vsel %vm1006_vm1, %v980_v10, -inf  ;;  %v3082_v43 = vsel %vm1006_vm1, %v981_v17, -inf }
 0x127   :  { %v2146_v31 = vpop.f32.mrb[25].mxu0 }
 0x128   :  { %v3037_v33 = vsel %vm1006_vm1, %v984_v27, -inf  ;;  %v985_v35 = vmax.f32 %v891_v29, 0.0  ;;  %v2147_v36 = vadd.f32 %v2146_v31, %v2145_v30  ;;  %v2148_v38 = vpop.f32.mrb[26].mxu0 }
 0x129   :  { %v1023_v53 = vmax.f32 %v3034_v32, %v3037_v33  ;;  %v2149_v39 = vpop.f32.mrb[27].mxu0  ;;  %v895_v41 = vpop.f32.mrb[24].mxu1 }
 0x12a   :  { %v3045_v42 = vsel %vm1006_vm1, %v985_v35, -inf  ;;  %v2150_v44 = vadd.f32 %v2149_v39, %v2148_v38  ;;  %v735_v45 = vadd.f32 %v2147_v36, %v2899_v28  ;;  %v897_v46 = vpop.f32.mrb[25].mxu1 }
 0x12b   :  { %v1030_v47 = vmax.f32 %v3042_v58, %v3045_v42  ;;  %v898_v48 = vpop.f32.mrb[26].mxu1 }
 0x12c   :  { %v896_v50 = vadd.f32 %v895_v41, %v735_v45  ;;  %v738_v51 = vadd.f32 %v2150_v44, %v2899_v28  ;;  %v900_v52 = vpop.f32.mrb[27].mxu1 }
 0x12e   :  { %v986_v55 = vmax.f32 %v896_v50, 0.0  ;;  %v899_v56 = vadd.f32 %v898_v48, %v738_v51  ;;  %v2151_v57 = vpop.f32.mrb[28].mxu0 }
 0x12f   :  { %v2152_v59 = vpop.f32.mrb[29].mxu0 }
 0x130   :  { %v3057_v61 = vsel %vm1006_vm1, %v986_v55, -inf  ;;  %v987_v62 = vmax.f32 %v899_v56, 0.0  ;;  %v2153_v63 = vadd.f32 %v2152_v59, %v2151_v57  ;;  %v2154_v0 = vpop.f32.mrb[30].mxu0 }
 0x131   :  { %v1037_v11 = vmax.f32 %v3054_v60, %v3057_v61  ;;  %v2155_v1 = vpop.f32.mrb[31].mxu0  ;;  %v903_v2 = vpop.f32.mrb[28].mxu1 }
 0x132   :  { %v3065_v37 = vsel %vm1006_vm1, %v987_v62, -inf  ;;  %v2156_v3 = vadd.f32 %v2155_v1, %v2154_v0  ;;  %v743_v4 = vadd.f32 %v2153_v63, %v2899_v28  ;;  %v905_v5 = vpop.f32.mrb[29].mxu1 }
 0x133   :  { %v1044_v8 = vmax.f32 %v3062_v18, %v3065_v37  ;;  %v906_v9 = vpop.f32.mrb[30].mxu1 }
 0x134   :  { %v904_v13 = vadd.f32 %v903_v2, %v743_v4  ;;  %v746_v40 = vadd.f32 %v2156_v3, %v2899_v28  ;;  %v908_v16 = vpop.f32.mrb[31].mxu1 }
 0x136   :  { %v988_v19 = vmax.f32 %v904_v13, 0.0  ;;  %v907_v21 = vadd.f32 %v906_v9, %v746_v40  ;;  %v2157_v22 = vpop.f32.mrb[32].mxu0 }
 0x137   :  { %v2158_v23 = vpop.f32.mrb[33].mxu0 }
 0x138   :  { %v3077_v25 = vsel %vm1006_vm1, %v988_v19, -inf  ;;  %v989_v26 = vmax.f32 %v907_v21, 0.0  ;;  %v2159_v27 = vadd.f32 %v2158_v23, %v2157_v22  ;;  %v2160_v29 = vpop.f32.mrb[34].mxu0 }
 0x139   :  { %v1051_v34 = vmax.f32 %v3074_v24, %v3077_v25  ;;  %v2161_v30 = vpop.f32.mrb[35].mxu0  ;;  %v911_v31 = vpop.f32.mrb[32].mxu1 }
 0x13a   :  { %v3085_v35 = vsel %vm1006_vm1, %v989_v26, -inf  ;;  %v2162_v36 = vadd.f32 %v2161_v30, %v2160_v29  ;;  %v751_v38 = vadd.f32 %v2159_v27, %v2899_v28  ;;  %v913_v39 = vpop.f32.mrb[33].mxu1 }
 0x13b   :  { %v1058_v41 = vmax.f32 %v3082_v43, %v3085_v35  ;;  %v914_v44 = vpop.f32.mrb[34].mxu1 }
 0x13c   :  { %v912_v45 = vadd.f32 %v911_v31, %v751_v38  ;;  %v754_v46 = vadd.f32 %v2162_v36, %v2899_v28  ;;  %v916_v48 = vpop.f32.mrb[35].mxu1 }
 0x13e   :  { %v990_v49 = vmax.f32 %v912_v45, 0.0  ;;  %v915_v50 = vadd.f32 %v914_v44, %v754_v46  ;;  %v2163_v51 = vpop.f32.mrb[36].mxu0 }
 0x13f   :  { %v2164_v52 = vpop.f32.mrb[37].mxu0 }
 0x140   :  { %v1010_v54 = vsel %vm1006_vm1, %v990_v49, -inf  ;;  %v991_v55 = vmax.f32 %v915_v50, 0.0  ;;  %v2165_v56 = vadd.f32 %v2164_v52, %v2163_v51  ;;  %v2166_v57 = vpop.f32.mrb[38].mxu0 }
 0x141   :  { %v3095_v59 = vmax.f32 %v1009_v12, %v1010_v54  ;;  %v2167_v62 = vpop.f32.mrb[39].mxu0  ;;  %v919_v63 = vpop.f32.mrb[36].mxu1 }
 0x142   :  { %v1017_v0 = vsel %vm1006_vm1, %v991_v55, -inf  ;;  %v2168_v1 = vadd.f32 %v2167_v62, %v2166_v57  ;;  %v759_v2 = vadd.f32 %v2165_v56, %v2899_v28  ;;  %v921_v3 = vpop.f32.mrb[37].mxu1 }
 0x143   :  { %v3102_v4 = vmax.f32 %v1016_v20, %v1017_v0  ;;  %v922_v5 = vpop.f32.mrb[38].mxu1 }
 0x144   :  { %v920_v9 = vadd.f32 %v919_v63, %v759_v2  ;;  %v762_v10 = vadd.f32 %v2168_v1, %v2899_v28  ;;  %v924_v6 = vpop.f32.mrb[39].mxu1 }
 0x146   :  { %v992_v7 = vmax.f32 %v920_v9, 0.0  ;;  %v923_v12 = vadd.f32 %v922_v5, %v762_v10  ;;  %v2169_v13 = vpop.f32.mrb[40].mxu0 }
 0x147   :  { %v2170_v40 = vpop.f32.mrb[41].mxu0 }
 0x148   :  { %v1024_v16 = vsel %vm1006_vm1, %v992_v7, -inf  ;;  %v993_v17 = vmax.f32 %v923_v12, 0.0  ;;  %v2171_v19 = vadd.f32 %v2170_v40, %v2169_v13  ;;  %v2172_v21 = vpop.f32.mrb[42].mxu0 }
 0x149   :  { %v3109_v14 = vmax.f32 %v1023_v53, %v1024_v16  ;;  %v2173_v15 = vpop.f32.mrb[43].mxu0  ;;  %v927_v20 = vpop.f32.mrb[40].mxu1 }
 0x14a   :  { %v1031_v22 = vsel %vm1006_vm1, %v993_v17, -inf  ;;  %v2174_v23 = vadd.f32 %v2173_v15, %v2172_v21  ;;  %v767_v26 = vadd.f32 %v2171_v19, %v2899_v28  ;;  %v929_v27 = vpop.f32.mrb[41].mxu1 }
 0x14b   :  { %v3116_v29 = vmax.f32 %v1030_v47, %v1031_v22  ;;  %v930_v30 = vpop.f32.mrb[42].mxu1 }
 0x14c   :  { %v928_v31 = vadd.f32 %v927_v20, %v767_v26  ;;  %v770_v36 = vadd.f32 %v2174_v23, %v2899_v28  ;;  %v932_v32 = vpop.f32.mrb[43].mxu1 }
 0x14e   :  { %v994_v33 = vmax.f32 %v928_v31, 0.0  ;;  %v931_v53 = vadd.f32 %v930_v30, %v770_v36  ;;  %v2175_v38 = vpop.f32.mrb[44].mxu0 }
 0x14f   :  { %v2176_v39 = vpop.f32.mrb[45].mxu0 }
 0x150   :  { %v1038_v44 = vsel %vm1006_vm1, %v994_v33, -inf  ;;  %v995_v45 = vmax.f32 %v931_v53, 0.0  ;;  %v2177_v46 = vadd.f32 %v2176_v39, %v2175_v38  ;;  %v2178_v48 = vpop.f32.mrb[46].mxu0 }
 0x151   :  { %v3123_v58 = vmax.f32 %v1037_v11, %v1038_v44  ;;  %v2179_v42 = vpop.f32.mrb[47].mxu0  ;;  %v935_v47 = vpop.f32.mrb[44].mxu1 }
 0x152   :  { %v1045_v49 = vsel %vm1006_vm1, %v995_v45, -inf  ;;  %v2180_v50 = vadd.f32 %v2179_v42, %v2178_v48  ;;  %v775_v51 = vadd.f32 %v2177_v46, %v2899_v28  ;;  %v937_v52 = vpop.f32.mrb[45].mxu1 }
 0x153   :  { %v3130_v54 = vmax.f32 %v1044_v8, %v1045_v49  ;;  %v938_v55 = vpop.f32.mrb[46].mxu1 }
 0x154   :  { %v936_v56 = vadd.f32 %v935_v47, %v775_v51  ;;  %v778_v57 = vadd.f32 %v2180_v50, %v2899_v28  ;;  %v940_v60 = vpop.f32.mrb[47].mxu1 }
 0x156   :  { %v996_v61 = vmax.f32 %v936_v56, 0.0  ;;  %v939_v11 = vadd.f32 %v938_v55, %v778_v57  ;;  %v2181_v62 = vpop.f32.mrb[48].mxu0 }
 0x157   :  { %v2182_v63 = vpop.f32.mrb[49].mxu0 }
 0x158   :  { %v1052_v0 = vsel %vm1006_vm1, %v996_v61, -inf  ;;  %v997_v1 = vmax.f32 %v939_v11, 0.0  ;;  %v2183_v2 = vadd.f32 %v2182_v63, %v2181_v62  ;;  %v2184_v3 = vpop.f32.mrb[50].mxu0 }
 0x159   :  { %v3137_v18 = vmax.f32 %v1051_v34, %v1052_v0  ;;  %v2185_v37 = vpop.f32.mrb[51].mxu0  ;;  %v943_v8 = vpop.f32.mrb[48].mxu1 }
 0x15a   :  { %v1059_v5 = vsel %vm1006_vm1, %v997_v1, -inf  ;;  %v2186_v9 = vadd.f32 %v2185_v37, %v2184_v3  ;;  %v783_v10 = vadd.f32 %v2183_v2, %v2899_v28  ;;  %v945_v6 = vpop.f32.mrb[49].mxu1 }
 0x15b   :  { %v3144_v7 = vmax.f32 %v1058_v41, %v1059_v5  ;;  %v946_v12 = vpop.f32.mrb[50].mxu1 }
 0x15c   :  { %v944_v13 = vadd.f32 %v943_v8, %v783_v10  ;;  %v786_v40 = vadd.f32 %v2186_v9, %v2899_v28  ;;  %v948_v24 = vpop.f32.mrb[51].mxu1 }
 0x15e   :  { %v998_v25 = vmax.f32 %v944_v13, 0.0  ;;  %v947_v34 = vadd.f32 %v946_v12, %v786_v40  ;;  %v2187_v16 = vpop.f32.mrb[52].mxu0 }
 0x15f   :  { %v2188_v17 = vpop.f32.mrb[53].mxu0 }
 0x160   :  { %v1012_v19 = vsel %vm1006_vm1, %v998_v25, -inf  ;;  %v999_v21 = vmax.f32 %v947_v34, 0.0  ;;  %v2189_v15 = vadd.f32 %v2188_v17, %v2187_v16  ;;  %v2190_v20 = vpop.f32.mrb[54].mxu0 }
 0x161   :  { %v3149_v22 = vmax.f32 %v3095_v59, %v1012_v19  ;;  %v2191_v43 = vpop.f32.mrb[55].mxu0  ;;  %v951_v35 = vpop.f32.mrb[52].mxu1 }
 0x162   :  { %v1019_v41 = vsel %vm1006_vm1, %v999_v21, -inf  ;;  %v2192_v23 = vadd.f32 %v2191_v43, %v2190_v20  ;;  %v791_v26 = vadd.f32 %v2189_v15, %v2899_v28  ;;  %v953_v27 = vpop.f32.mrb[53].mxu1 }
 0x163   :  { %v3154_v30 = vmax.f32 %v3102_v4, %v1019_v41  ;;  %v954_v31 = vpop.f32.mrb[54].mxu1  ;;  %v1080_v57 = vrot.slane %v3149_v22, 3  ;;  %v1102_v60 = vrot.slane %v3149_v22, 7  ;;  %v1090_v63 = vrot.slane %v3149_v22, 5 }
 0x164   :  { %v952_v36 = vadd.f32 %v951_v35, %v791_v26  ;;  %v794_v32 = vadd.f32 %v2192_v23, %v2899_v28  ;;  %v956_v33 = vpop.f32.mrb[55].mxu1  ;;  %v1074_v0 = vrot.slane %v3149_v22, 2  ;;  %v1096_v1 = vrot.slane %v3149_v22, 6 }
 0x165   :  { %v1134_v2 = vrot.slane %v3154_v30, 5  ;;  %v1113_v3 = vrot.slane %v3154_v30, 1  ;;  %v1140_v37 = vrot.slane %v3154_v30, 6  ;;  %v1118_v10 = vrot.slane %v3154_v30, 2 }
 0x166   :  { %v1000_v53 = vmax.f32 %v952_v36, 0.0  ;;  %v955_v38 = vadd.f32 %v954_v31, %v794_v32  ;;  %v2193_v59 = vpop.f32.mrb[56].mxu0  ;;  %v1146_v6 = vrot.slane %v3154_v30, 7  ;;  %v1124_v40 = vrot.slane %v3154_v30, 3 }
 0x167   :  { %v2194_v39 = vpop.f32.mrb[57].mxu0  ;;  %v1086_v24 = vrot.slane %v3149_v22, 4  ;;  %v1130_v25 = vrot.slane %v3154_v30, 4 }
 0x168   :  { %v1026_v44 = vsel %vm1006_vm1, %v1000_v53, -inf  ;;  %v1001_v45 = vmax.f32 %v955_v38, 0.0  ;;  %v2195_v46 = vadd.f32 %v2194_v39, %v2193_v59  ;;  %v2196_v48 = vpop.f32.mrb[58].mxu0 }
 0x169   :  { %v3159_v42 = vmax.f32 %v3109_v14, %v1026_v44  ;;  %v2197_v47 = vpop.f32.mrb[59].mxu0  ;;  %v959_v4 = vpop.f32.mrb[56].mxu1  ;;  %v1069_v14 = vrot.slane %v3149_v22, 1 }
 0x16a   :  { %v3162_v49 = vsel %vm1006_vm1, %v1001_v45, -inf  ;;  %v2198_v50 = vadd.f32 %v2197_v47, %v2196_v48  ;;  %v799_v51 = vadd.f32 %v2195_v46, %v2899_v28  ;;  %v961_v52 = vpop.f32.mrb[57].mxu1 }
 0x16b   :  { %v1034_v55 = vmax.f32 %v3116_v29, %v3162_v49  ;;  %v962_v56 = vpop.f32.mrb[58].mxu1  ;;  %v1192_v13 = vrot.slane %v3159_v42, 5  ;;  %v1171_v21 = vrot.slane %v3159_v42, 1  ;;  %v1198_v35 = vrot.slane %v3159_v42, 6 }
 0x16c   :  { %v960_v61 = vadd.f32 %v959_v4, %v799_v51  ;;  %v802_v11 = vadd.f32 %v2198_v50, %v2899_v28  ;;  %v964_v62 = vpop.f32.mrb[59].mxu1  ;;  %v1176_v41 = vrot.slane %v3159_v42, 2  ;;  %v1204_v23 = vrot.slane %v3159_v42, 7 }
 0x16d   :  { %v1182_v32 = vrot.slane %v3159_v42, 3  ;;  %v1188_v49 = vrot.slane %v3159_v42, 4 }
 0x16e   :  { %v1002_v8 = vmax.f32 %v960_v61, 0.0  ;;  %v963_v5 = vadd.f32 %v962_v56, %v802_v11  ;;  %v2199_v9 = vpop.f32.mrb[60].mxu0  ;;  %v2513_v61 = vld [vmem:[%s3436_s3 + $0xf0] sm:$0xff]  }
 0x16f   :  { %v2200_v12 = vpop.f32.mrb[61].mxu0  ;;  %2239 = vmatprep.subr.bf16.mxu1 %v2513_v61 }
 0x170   :  { %v1040_v34 = vsel %vm1006_vm1, %v1002_v8, -inf  ;;  %v1003_v16 = vmax.f32 %v963_v5, 0.0  ;;  %v2201_v17 = vadd.f32 %v2200_v12, %v2199_v9  ;;  %v2202_v19 = vpop.f32.mrb[62].mxu0 }
 0x171   :  { %v3186_v15 = vmax.f32 %v3123_v58, %v1040_v34  ;;  %v2203_v20 = vpop.f32.mrb[63].mxu0  ;;  %v967_v43 = vpop.f32.mrb[60].mxu1 }
 0x172   :  { %v1047_v26 = vsel %vm1006_vm1, %v1003_v16, -inf  ;;  %v2204_v27 = vadd.f32 %v2203_v20, %v2202_v19  ;;  %v807_v31 = vadd.f32 %v2201_v17, %v2899_v28  ;;  %v969_v36 = vpop.f32.mrb[61].mxu1 }
 0x173   :  { %v3195_v33 = vmax.f32 %v3130_v54, %v1047_v26  ;;  %v970_v58 = vpop.f32.mrb[62].mxu1  ;;  %v1081_v53 = vrot.slane %v3186_v15, 2  ;;  %v1103_v38 = vrot.slane %v3186_v15, 6  ;;  %v1070_v59 = vsel %vm1066_vm2, %v3186_v15, %v1069_v14 }
 0x174   :  { %v968_v39 = vadd.f32 %v967_v43, %v807_v31  ;;  %v810_v44 = vadd.f32 %v2204_v27, %v2899_v28  ;;  %v1091_v45 = vrot.slane %v3186_v15, 4  ;;  %v1075_v46 = vrot.slane %v3186_v15, 1  ;;  %v972_v48 = vpop.f32.mrb[63].mxu1  ;;  %v2512_v28 = vld [vmem:[%s3436_s3 + $0x140] sm:$0xff]  }
 0x175   :  { %v1082_v47 = vsel %vm1066_vm2, %v1081_v53, %v1080_v57  ;;  %v1104_v54 = vsel %vm1066_vm2, %v1103_v38, %v1102_v60  ;;  %v1097_v4 = vrot.slane %v3186_v15, 5  ;;  %v1135_v50 = vrot.slane %v3195_v33, 4  ;;  %2249 = vmatprep.subr.bf16.mxu0 %v2512_v28 }
 0x176   :  { %v1004_v51 = vmax.f32 %v968_v39, 0.0  ;;  %v971_v52 = vadd.f32 %v970_v58, %v810_v44  ;;  %v2328_v56 = vpack.i.bf16 %v1082_v47, %v1104_v54  ;;  %v1092_v14 = vsel %vm1066_vm2, %v1091_v45, %v1090_v63 }
 0x177   :  { %v2318_v57 = vpack.i.bf16 %v1070_v59, %v1092_v14  ;;  %v1076_v60 = vsel %vm1066_vm2, %v1075_v46, %v1074_v0  ;;  %v1098_v11 = vsel %vm1066_vm2, %v1097_v4, %v1096_v1  ;;  %v1136_v62 = vsel %vm1066_vm2, %v1135_v50, %v1134_v2 }
 0x178   :  { %v1054_v8 = vsel %vm1006_vm1, %v1004_v51, -inf  ;;  %v1005_v5 = vmax.f32 %v971_v52, 0.0  ;;  %2329 = vrot.lane.b32.xlu1 %v2328_v56, %s2567_s20  ;;  %v2323_v63 = vpack.i.bf16 %v1076_v60, %v1098_v11  ;;  %v1114_v9 = vsel %vm1066_vm2, %v3195_v33, %v1113_v3 }
 0x179   :  { %v1055_v12 = vmax.f32 %v3137_v18, %v1054_v8  ;;  %2319 = vrot.lane.b32.xlu0 %v2318_v57, %s2568_s21  ;;  %v1141_v0 = vrot.slane %v3195_v33, 5  ;;  %v1119_v1 = vrot.slane %v3195_v33, 1  ;;  %v1147_v2 = vrot.slane %v3195_v33, 6  ;;  %v2515_v18 = vld [vmem:[%s3436_s3 + $0xb0] sm:$0xff]  }
 0x17a   :  { %v1061_v34 = vsel %vm1006_vm1, %v1005_v5, -inf  ;;  %v1125_v16 = vrot.slane %v3195_v33, 2  ;;  %v1065_v17 = vrot.slane %v3186_v15, 7  ;;  %v1087_v3 = vrot.slane %v3186_v15, 3  ;;  %2240 = vmatpush3.bf16.msra.mxu1 %v2515_v18 }
 0x17b   :  { %v1062_v19 = vmax.f32 %v3144_v7, %v1061_v34  ;;  %v1193_v20 = vrot.slane %v1055_v12, 4  ;;  %v1172_v43 = vsel %vm1066_vm2, %v1055_v12, %v1171_v21  ;;  %v1142_v26 = vsel %vm1066_vm2, %v1141_v0, %v1140_v37 }
 0x17c   :  { %v2333_v27 = vpack.i.bf16 %v1114_v9, %v1172_v43  ;;  %v1199_v31 = vrot.slane %v1055_v12, 5  ;;  %v1120_v36 = vsel %vm1066_vm2, %v1119_v1, %v1118_v10  ;;  %v1177_v15 = vrot.slane %v1055_v12, 1  ;;  %v2514_v1 = vld [vmem:[%s3436_s3 + $0x100] sm:$0xff]   ;;  %v2517_v43 = vld [vmem:[%s3436_s3 + $0x108] sm:$0xff]  }
 0x17d   :  { %v1212_v58 = vrot.slane %v1062_v19, 7  ;;  %2324 = vrot.lane.b32.xlu0 %v2323_v63, %s2569_s24  ;;  %v1194_v7 = vsel %vm1066_vm2, %v1193_v20, %v1192_v13  ;;  %v1148_v37 = vsel %vm1066_vm2, %v1147_v2, %v1146_v6  ;;  %v1205_v21 = vrot.slane %v1055_v12, 6  ;;  %v2516_v2 = vld [vmem:[%s3436_s3 + $0x148] sm:$0xff]  }
 0x17e   :  { %v2338_v53 = vpack.i.bf16 %v1136_v62, %v1194_v7  ;;  %v1200_v10 = vsel %vm1066_vm2, %v1199_v31, %v1198_v35  ;;  %v1178_v38 = vsel %vm1066_vm2, %v1177_v15, %v1176_v41  ;;  %v1126_v59 = vsel %vm1066_vm2, %v1125_v16, %v1124_v40  ;;  %v2518_v41 = vld [vmem:[%s3436_s3 + $0xf8] sm:$0xff]  }
 0x17f   :  { %v3262_v13 = vsel %vm1066_vm2, %v1212_v58, %v1034_v55  ;;  %v2343_v6 = vpack.i.bf16 %v1142_v26, %v1200_v10  ;;  %v2348_v39 = vpack.i.bf16 %v1120_v36, %v1178_v38  ;;  %v1206_v35 = vsel %vm1066_vm2, %v1205_v21, %v1204_v23  ;;  %v2520_v55 = vld [vmem:[%s3436_s3 + $0xb8] sm:$0xff]   ;;  %2241 = vmatprep.subr.bf16.mxu1 %v2518_v41 }
 0x180   :  { %2339 = vrot.lane.b32.xlu1 %v2338_v53, %s2568_s21  ;;  %v2353_v44 = vpack.i.bf16 %v1148_v37, %v1206_v35  ;;  %v1183_v40 = vrot.slane %v1055_v12, 2  ;;  %v1088_v29 = vsel %vm1066_vm2, %v1087_v3, %v1086_v24  ;;  %v1067_v23 = vsel %vm1066_vm2, %v1065_v17, %v3149_v22  ;;  %2242 = vmatpush3.bf16.msra.mxu1 %v2520_v55  ;;  %v2523_v55 = vld [vmem:[%s3436_s3 + $0x118] sm:$0xff]  }
 0x181   :  { %2334 = vrot.lane.b32.xlu0 %v2333_v27, %s2568_s21  ;;  %v1131_v45 = vrot.slane %v3195_v33, 3  ;;  %v1189_v46 = vrot.slane %v1055_v12, 3  ;;  %v1110_v48 = vrot.slane %v3195_v33, 7  ;;  %v1168_v47 = vrot.slane %v1055_v12, 7  ;;  %v2519_v27 = vld [vmem:[%s3436_s3 + $0x150] sm:$0xff]  }
 0x182   :  { %v1184_v24 = vsel %vm1066_vm2, %v1183_v40, %v1182_v32  ;;  %v2570_v32 = vmov 0.0  }
 0x183   :  { %v2358_v54 = vpack.i.bf16 %v1126_v59, %v1184_v24  ;;  %v1132_v4 = vsel %vm1066_vm2, %v1131_v45, %v1130_v25  ;;  %v1190_v50 = vsel %vm1066_vm2, %v1189_v46, %v1188_v49  ;;  %v1111_v22 = vsel %vm1066_vm2, %v1110_v48, %v3154_v30  ;;  %2291 = vmatprep.subr.bf16.mxu1 %v2570_v32  ;;  %v2521_v59 = vld [vmem:[%s3436_s3 + $0x110] sm:$0xff]   ;;  %v2525_v45 = vld [vmem:[%s3436_s3 + $0x120] sm:$0xff]   ;;  %v2526_v46 = vld [vmem:[%s3436_s3 + $0x168] sm:$0xff]  }
 0x184   :  { %2344 = vrot.lane.b32.xlu1 %v2343_v6, %s2569_s24  ;;  %v3295_v33 = vsel %vm1066_vm2, %v1168_v47, %v3159_v42  ;;  %v2527_v48 = vld [vmem:[%s3436_s3 + $0x128] sm:$0xff]   ;;  %v2528_v24 = vld [vmem:[%s3436_s3 + $0x170] sm:$0xff]  }
 0x185   :  { %2349 = vrot.lane.b32.xlu0 %v2348_v39, %s2569_s24 }
 0x188   :  { %2354 = vrot.lane.b32.xlu1 %v2353_v44, %s2567_s20 }
 0x189   :  { %2359 = vrot.lane.b32.xlu0 %v2358_v54, %s2567_s20  ;;  %v2529_v54 = vld [vmem:[%s3436_s3 + $0x130] sm:$0xff]  }
 0x1ea   :  { %v2330_v56 = vpop.permute.xlu1 %2329 }
 0x1eb   :  { %v2320_v25 = vpop.permute.xlu0 %2319  ;;  %v2332_v42 = vunpack.i.h.bf16 %v2330_v56  ;;  %v2331_v61 = vunpack.i.l.bf16 %v2330_v56 }
 0x1ec   :  { %v2322_v51 = vunpack.i.h.bf16 %v2320_v25  ;;  %v2321_v52 = vunpack.i.l.bf16 %v2320_v25 }
 0x1ee   :  { %v1152_v57 = vsel %vm1006_vm1, %v1067_v23, %v2322_v51  ;;  %v1157_v60 = vsel %vm1006_vm1, %v1088_v29, %v2321_v52  ;;  %v2522_v29 = vld [vmem:[%s3436_s3 + $0x158] sm:$0xff]   ;;  %v2524_v23 = vld [vmem:[%s3436_s3 + $0x160] sm:$0xff]  }
 0x1ef   :  { %v2325_v30 = vpop.permute.xlu0 %2324  ;;  %v2531_v51 = vld [vmem:[%s3436_s3 + $0x138] sm:$0xff]  }
 0x1f0   :  { %v2327_v14 = vunpack.i.h.bf16 %v2325_v30  ;;  %v2326_v28 = vunpack.i.l.bf16 %v2325_v30  ;;  %v2532_v30 = vld [vmem:[%s3436_s3 + $0x180] sm:$0xff]  }
 0x1f2   :  { %v1154_v11 = vsel %vm1153_vm3, %v1152_v57, %v2327_v14  ;;  %v1158_v62 = vsel %vm1153_vm3, %v1157_v60, %v2326_v28  ;;  %v2340_v8 = vpop.permute.xlu1 %2339  ;;  %v1227_v28 = vpack.c.bf16 %v3262_v13, %v3262_v13  ;;  %v2536_v57 = vld [vmem:[%s3438_s5 + $0x10] sm:$0xff]   ;;  %v2537_v13 = vld [vmem:[%s3438_s5 + $0x18] sm:$0xff]   ;;  %v2538_v60 = vld [vmem:[%s3438_s5 + $0x20] sm:$0xff]  }
 0x1f3   :  { %v1156_v5 = vsel %vm1155_vm4, %v1154_v11, %v2332_v42  ;;  %v3306_v63 = vpop.permute.xlu0 %2334  ;;  %v1159_v9 = vsel %vm1155_vm4, %v1158_v62, %v2331_v61  ;;  %v2342_v16 = vunpack.i.h.bf16 %v2340_v8  ;;  %v2341_v17 = vunpack.i.l.bf16 %v2340_v8  ;;  %v2534_v42 = vld [vmem:[%s3438_s5] sm:$0xff]   ;;  %v2535_v61 = vld [vmem:[%s3438_s5 + $0x8] sm:$0xff]   ;;  %v2540_v62 = vld [vmem:[%s3438_s5 + $0x30] sm:$0xff]  }
 0x1f4   :  { %v1221_v12 = vpack.c.bf16 %v1156_v5, %v1156_v5  ;;  %v1222_v0 = vpack.c.bf16 %v1159_v9, %v1159_v9  ;;  %v2337_v18 = vunpack.i.h.bf16 %v3306_v63  ;;  %v2336_v47 = vunpack.i.l.bf16 %v3306_v63  ;;  %v2539_v11 = vld [vmem:[%s3438_s5 + $0x28] sm:$0xff]   ;;  %v2541_v8 = vld [vmem:[%s3438_s5 + $0x38] sm:$0xff]  }
 0x1f5   :  { %v1163_v36 = vsel %vm1006_vm1, %v1132_v4, %v2342_v16  ;;  %v1218_v15 = vsel %vm1006_vm1, %v1190_v50, %v2341_v17  ;;  %v2530_v50 = vld [vmem:[%s3436_s3 + $0x178] sm:$0xff]  }
 0x1f6   :  { %1670 = vmatprep.mubr.bf16.mxu0 %v1222_v0  ;;  %v2345_v34 = vpop.permute.xlu1 %2344  ;;  %v1160_v21 = vsel %vm1006_vm1, %v1111_v22, %v2337_v18  ;;  %v1215_v25 = vsel %vm1006_vm1, %v3295_v33, %v2336_v47  ;;  %v2533_v33 = vld [vmem:[%s3436_s3 + $0x188] sm:$0xff]  }
 0x1f7   :  { %v2350_v3 = vpop.permute.xlu0 %2349  ;;  %1671 = vmatmul.mubr.bf16.vlgmr.msra.gmra.mrb[64].mxu0 %v1221_v12  ;;  %v2347_v19 = vunpack.i.h.bf16 %v2345_v34  ;;  %v2346_v20 = vunpack.i.l.bf16 %v2345_v34 }
 0x1f8   :  { %2250 = vmatpush3.bf16.msra.mxu0 %v2514_v1  ;;  %v2352_v26 = vunpack.i.h.bf16 %v2350_v3  ;;  %v2351_v4 = vunpack.i.l.bf16 %v2350_v3  ;;  %v2032_v1 = vld [vmem:[%s3437_s4] ss:$0 sm:$0xff] }
 0x1f9   :  { %2251 = vmatprep.subr.bf16.mxu0 %v2516_v2  ;;  %v1164_v53 = vsel %vm1153_vm3, %v1163_v36, %v2347_v19  ;;  %v1219_v10 = vsel %vm1153_vm3, %v1218_v15, %v2346_v20 }
 0x1fa   :  { %v2355_v31 = vpop.permute.xlu1 %2354  ;;  %v1161_v6 = vsel %vm1153_vm3, %v1160_v21, %v2352_v26  ;;  %v1216_v52 = vsel %vm1153_vm3, %v1215_v25, %v2351_v4 }
 0x1fb   :  { %v2357_v58 = vunpack.i.h.bf16 %v2355_v31  ;;  %v2356_v7 = vunpack.i.l.bf16 %v2355_v31  ;;  %v2360_v37 = vpop.permute.xlu0 %2359 }
 0x1fc   :  { %v2362_v38 = vunpack.i.h.bf16 %v2360_v37  ;;  %2252 = vmatpush3.bf16.msra.mxu0 %v2517_v43  ;;  %v2361_v22 = vunpack.i.l.bf16 %v2360_v37 }
 0x1fd   :  { %2253 = vmatprep.subr.bf16.mxu0 %v2519_v27  ;;  %v1165_v39 = vsel %vm1155_vm4, %v1164_v53, %v2357_v58  ;;  %v1220_v35 = vsel %vm1155_vm4, %v1219_v10, %v2356_v7  ;;  %v2084_v10 = vld [vmem:[%s3439_s6] ss:$0 sm:$0xff] }
 0x1fe   :  { %v1162_v41 = vsel %vm1155_vm4, %v1161_v6, %v2362_v38  ;;  %v1224_v44 = vpack.c.bf16 %v1165_v39, %v1165_v39  ;;  %v1226_v40 = vpack.c.bf16 %v1220_v35, %v1220_v35  ;;  %v1217_v56 = vsel %vm1155_vm4, %v1216_v52, %v2361_v22 }
 0x1ff   :  { %v1223_v49 = vpack.c.bf16 %v1162_v41, %v1162_v41  ;;  %v1225_v14 = vpack.c.bf16 %v1217_v56, %v1217_v56 }
 0x200   :  { %2254 = vmatpush3.bf16.msra.mxu0 %v2521_v59  ;;  %1710 = vmatprep.mubr.bf16.mxu1 %v1224_v44 }
 0x201   :  { %1750 = vmatprep.mubr.bf16.mxu0 %v1226_v40  ;;  %1711 = vmatmul.mubr.bf16.vlgmr.msra.gmra.mrb[64].mxu1 %v1223_v49 }
 0x202   :  { %2255 = vmatprep.subr.bf16.mxu0 %v2522_v29  ;;  %2307 = vmatprep.mubr.msk.bf16.mxu1 %vm2571_vm5, %v2570_v32 }
 0x203   :  { %2292 = vmatpush3.bf16.msra.mxu1 %v2534_v42 }
 0x204   :  { %2256 = vmatpush3.bf16.msra.mxu0 %v2523_v55  ;;  %2293 = vmatprep.subr.bf16.mxu1 %v2570_v32 }
 0x205   :  { %2257 = vmatprep.subr.bf16.mxu0 %v2524_v23 }
 0x207   :  { %2294 = vmatpush3.bf16.msra.mxu1 %v2535_v61 }
 0x208   :  { %2258 = vmatpush3.bf16.msra.mxu0 %v2525_v45  ;;  %2295 = vmatprep.subr.bf16.mxu1 %v2570_v32 }
 0x209   :  { %2259 = vmatprep.subr.bf16.mxu0 %v2526_v46 }
 0x20b   :  { %2296 = vmatpush3.bf16.msra.mxu1 %v2536_v57 }
 0x20c   :  { %2260 = vmatpush3.bf16.msra.mxu0 %v2527_v48  ;;  %2297 = vmatprep.subr.bf16.mxu1 %v2570_v32 }
 0x20d   :  { %2261 = vmatprep.subr.bf16.mxu0 %v2528_v24 }
 0x20f   :  { %2298 = vmatpush3.bf16.msra.mxu1 %v2537_v13 }
 0x210   :  { %2262 = vmatpush3.bf16.msra.mxu0 %v2529_v54  ;;  %2299 = vmatprep.subr.bf16.mxu1 %v2570_v32 }
 0x211   :  { %2263 = vmatprep.subr.bf16.mxu0 %v2530_v50 }
 0x213   :  { %2300 = vmatpush3.bf16.msra.mxu1 %v2538_v60 }
 0x214   :  { %2264 = vmatpush3.bf16.msra.mxu0 %v2531_v51  ;;  %2301 = vmatprep.subr.bf16.mxu1 %v2570_v32 }
 0x215   :  { %2283 = vmatprep.subr.bf16.mxu0 %v2570_v32 }
 0x217   :  { %1751 = vmatmul.mubr.bf16.vlgmr.msra.gmra.mrb[68].mxu0 %v1225_v14  ;;  %2302 = vmatpush3.bf16.msra.mxu1 %v2539_v11 }
 0x218   :  { %2284 = vmatpush3.bf16.msra.mxu0 %v2532_v30  ;;  %2287 = vmatprep.mubr.msk.bf16.mxu0 %vm2571_vm5, %v2570_v32 }
 0x219   :  { %2285 = vmatprep.subr.bf16.mxu0 %v2570_v32  ;;  %2303 = vmatprep.subr.bf16.mxu1 %v2570_v32 }
 0x21b   :  { %2304 = vmatpush3.bf16.msra.mxu1 %v2540_v62 }
 0x21c   :  { %2286 = vmatpush3.bf16.msra.mxu0 %v2533_v33  ;;  %2305 = vmatprep.subr.bf16.mxu1 %v2570_v32 }
 0x21f   :  { %2288 = vmatmul.mubr.msk.bf16.vlgmr.msra.gmra.mrb[72].mxu0 %vm1006_vm1, %v1227_v28  ;;  %2306 = vmatpush3.bf16.msra.mxu1 %v2541_v8 }
 0x2ca   :  { %v2221_v5 = vpop.f32.mrb[64].mxu0 }
 0x2cb   :  { %v2222_v63 = vpop.f32.mrb[65].mxu0 }
 0x2cc   :  { %v2223_v9 = vadd.f32 %v2222_v63, %v2221_v5  ;;  %v2224_v12 = vpop.f32.mrb[66].mxu0 }
 0x2cd   :  { %v2225_v0 = vpop.f32.mrb[67].mxu0 }
 0x2ce   :  { %v1673_v16 = vadd.f32 %v2223_v9, %v2032_v1 }
 0x2d4   :  { %v2243_v2 = vpop.f32.mrb[64].mxu1 }
 0x2d5   :  { %v2244_v34 = vpop.f32.mrb[65].mxu1 }
 0x2d6   :  { %v2245_v17 = vadd.f32 %v2244_v34, %v2243_v2  ;;  %v2246_v3 = vpop.f32.mrb[66].mxu1 }
 0x2d7   :  { %v2247_v18 = vpop.f32.mrb[67].mxu1 }
 0x2d8   :  { %v1713_v19 = vadd.f32 %v2245_v17, %v1673_v16 }
 0x2ea   :  { %v2265_v20 = vpop.f32.mrb[68].mxu0 }
 0x2eb   :  { %v2266_v43 = vpop.f32.mrb[69].mxu0 }
 0x2ec   :  { %v2267_v32 = vadd.f32 %v2266_v43, %v2265_v20  ;;  %v2268_v26 = vpop.f32.mrb[70].mxu0 }
 0x2ed   :  { %v2269_v27 = vpop.f32.mrb[71].mxu0 }
 0x2ee   :  { %v1753_v31 = vadd.f32 %v2267_v32, %v1713_v19 }
 0x2f2   :  { %v1792_v36 = vpop.f32.mrb[72].mxu0 }
 0x2f3   :  { %v1793_v15 = vadd.f32 %v1792_v36, %v1753_v31  ;;  %v2289_v58 = vpop.f32.mrb[73].mxu0 }
 0x2f4   :  { %v1795_v7 = vpop.f32.mrb[74].mxu0 }
 0x2f5   :  { %v1798_v37 = vmax.f32 %v1793_v15, 0.0  ;;  %v2290_v21 = vpop.f32.mrb[75].mxu0 }
 0x2f7   :  { %v1799_v53 = vpack.c.bf16 %v1798_v37, %v1798_v37 }
 0x2f9   :  { %2308 = vmatmul.mubr.bf16.vlgmr.msra.gmra.mrb[68].mxu1 %v1799_v53 }
 0x3cc   :  { %v1905_v38 = vpop.f32.mrb[68].mxu1 }
 0x3cd   :  { %v1906_v59 = vadd.f32 %v2084_v10, %v1905_v38  ;;  %v2309_v6 = vpop.f32.mrb[69].mxu1 }
 0x3ce   :  { %v1908_v39 = vpop.f32.mrb[70].mxu1 }
 0x3cf   :  { %1911 = vst [vmem:[#allocation2] sm:$0x3] %v1906_v59  ;;  %v2310_v35 = vpop.f32.mrb[71].mxu1 }
 0x3d0   :  { %2553 = shalt.err (!%p2550_p4)
}
 0x3d1   :  { %s2554_s6 = scalar_lea.hbm %s3440_s7, 32 }
 0x3d2   :  { %p2555_p5 = scmp.ne.s32.totalorder %s3440_s7, %s2554_s6  ;;  %p2558_p6 = scmp.lt.u32.totalorder %s2554_s6, %s3440_s7 }
 0x3d4   :  { %p2560_p7 = pnand %p2558_p6, %p2555_p5 }
 0x3d6   :  { %2563 = shalt.err (!%p2560_p7)
}
 0x3d7   :  { %1921 = dma.vmem_to_hbm [thread:$0]  %s1919_s29, 32, %s3440_s7, [#allocation3]  }
 0x3d8   :  { %2564 = dma.done.wait [#allocation3], 32  }
 0x3d9   :  { %2565 = vsyncadd [#allocation3], 4294967264 }
 0x3da   :  { %1925 = vsyncpa [#allocation3], 1 }

</bundles_post_ra>
